<compile_context>
chip_gen: v7x
topology: tpu7x:2x2x1
jax: 0.10.0
libtpu: 0.0.40
codegen_flags: <defaults>
</compile_context>

<pallas_src>
import jax
import jax.numpy as jnp
import numpy as np
from jax.experimental import pallas as pl
from jax.experimental.pallas import tpu as pltpu


# ------------------------------ fused kernel --------------------------------

def fused_kernel(x_ref, wc_ref, bc_ref, wl_ref, bl_ref, o_ref):
    # x_ref : (TB, Kc)    im2row slab, Kc = Ho*3*Wpad*Cin
    # wc_ref: (Kc, F)     block-diagonal conv weight, F = Ho*Wo*Cout
    # bc_ref: (1, F)      conv bias broadcast in (i, j, o) lane order
    # wl_ref: (F, nout)   linear weight with PyTorch flatten(1) order folded in
    # bl_ref: (1, nout)
    # o_ref : (TB, nout)  softmax output
    #
    # Conv2d(stride=2, pad=1, k=3) + bias + ReLU in ONE matmul; feat[b, i*48+j*6+o]
    # equals relu(conv)[b, o, i, j], i.e. it is already the flattened feature row.
    feat = jnp.dot(x_ref[...], wc_ref[...], preferred_element_type=jnp.float32)
    feat = jnp.maximum(feat + bc_ref[...], 0.0)

    # Linear in ONE matmul.
    logits = jnp.dot(feat, wl_ref[...], preferred_element_type=jnp.float32) + bl_ref[...]

    # Softmax(dim=1), numerically stable, approx reciprocal on the EUP.
    m = jnp.max(logits, axis=-1, keepdims=True)
    e = jnp.exp(logits - m)
    s = jnp.sum(e, axis=-1, keepdims=True)
    o_ref[...] = e * pl.reciprocal(s, approx=True)


# --------------------------- one-time weight prep ----------------------------

def prepare_params(params, height, width):
    """Fold the PyTorch parameters into kernel-friendly layouts (cacheable)."""
    assert height % 2 == 0 and width % 2 == 0, "stride-2/pad-1 formulas assume even H, W"
    w_conv = params["w_conv"].astype(jnp.float32)     # (Cout, Cin, 3, 3) OIHW
    b_conv = params["b_conv"].astype(jnp.float32)     # (Cout,)
    w_lin = params["w_lin"].astype(jnp.float32)       # (nout, Cout*Ho*Wo)
    b_lin = params["b_lin"].astype(jnp.float32)       # (nout,)

    Cout, Cin = w_conv.shape[0], w_conv.shape[1]
    nout = w_lin.shape[0]
    H, W = height, width
    Ho, Wo = H // 2, W // 2
    Wpad = W + 2

    # Toeplitz-over-width conv weight (one padded input row-tap -> one output row):
    #   w_row[kh*Wpad*Cin + s*Cin + c, j*Cout + o] = w_conv[o, c, kh, s - 2j]   (0 <= s-2j < 3)
    kw = np.arange(3)[:, None, None]
    s = np.arange(Wpad)[None, :, None]
    j = np.arange(Wo)[None, None, :]
    sel = (s == 2 * j + kw).astype(np.float32)                     # (3, Wpad, Wo)
    w_row = jnp.einsum("wsj,ochw->hscjo", sel, w_conv)             # (3, Wpad, Cin, Wo, Cout)
    w_row = w_row.reshape(3 * Wpad * Cin, Wo * Cout)               # (216, 48)

    # Block-diagonal over output rows: ONE matmul produces the whole flattened feature map.
    #   w_big[i*216 + k, i*48 + l] = w_row[k, l]
    w_big = jnp.kron(jnp.eye(Ho, dtype=jnp.float32), w_row)        # (Ho*216, Ho*48)

    # Conv bias in the flattened (i, j, o) lane order.
    b_big = jnp.tile(b_conv, Ho * Wo).reshape(1, Ho * Wo * Cout)   # (1, 384)

    # Fold PyTorch flatten(1) order (o, i, j) into the linear weight:
    #   w_lin_f[i*Wo*Cout + j*Cout + o, n] = w_lin[n, o*Ho*Wo + i*Wo + j]
    w_lin_f = jnp.transpose(w_lin.reshape(nout, Cout, Ho, Wo), (2, 3, 1, 0))
    w_lin_f = w_lin_f.reshape(Ho * Wo * Cout, nout)                # (384, nout)

    return {"w_big": w_big, "b_big": b_big,
            "w_lin_f": w_lin_f, "b_lin": b_lin.reshape(1, nout)}


# --------------------------------- wrapper -----------------------------------

def model_forward(X, prep):
    w_big, b_big = prep["w_big"], prep["b_big"]
    w_lin_f, b_lin = prep["w_lin_f"], prep["b_lin"]

    B = X.shape[0]
    # torch permute(0,3,2,1): (B, W, H, Cin) -> NCHW; equivalent NHWC view is (B, H, W, Cin)
    x = jnp.transpose(X, (0, 2, 1, 3)).astype(jnp.float32)
    _, H, W, Cin = x.shape
    Ho, Wo = H // 2, W // 2
    Wpad = W + 2
    Kc = Ho * 3 * Wpad * Cin                         # 1728 for H=W=16, Cin=4
    F = w_lin_f.shape[0]                             # Ho*Wo*Cout = 384
    nout = b_lin.shape[-1]

    # XLA prologue (fuses into one fusion): pad, take the 3 stride-2 row taps, and lay
    # each batch element out as a single im2row lane-vector of length Kc.
    xpad = jnp.pad(x, ((0, 0), (1, 1), (1, 1), (0, 0)))            # (B, H+2, Wpad, Cin)
    taps = [xpad[:, kh:kh + 2 * Ho:2] for kh in range(3)]          # 3 x (B, Ho, Wpad, Cin)
    x_rows = jnp.stack(taps, axis=2).reshape(B, Kc)                # (B, Ho, 3, Wpad, Cin) -> (B, Kc)

    # Single grid step covering the whole batch (best for single-TC v5e/v6e; work is
    # tiny at this size).  For large B on v7x, split the batch into 2*k "parallel" steps.
    out = pl.pallas_call(
        fused_kernel,
        grid=(1,),
        in_specs=[
            pl.BlockSpec((B, Kc), lambda g: (0, 0)),
            pl.BlockSpec((Kc, F), lambda g: (0, 0)),
            pl.BlockSpec((1, F), lambda g: (0, 0)),
            pl.BlockSpec((F, nout), lambda g: (0, 0)),
            pl.BlockSpec((1, nout), lambda g: (0, 0)),
        ],
        out_specs=pl.BlockSpec((B, nout), lambda g: (0, 0)),
        out_shape=jax.ShapeDtypeStruct((B, nout), jnp.float32),
        compiler_params=pltpu.CompilerParams(dimension_semantics=("arbitrary",)),
    )(x_rows, w_big, b_big, w_lin_f, b_lin)

    return out


# ---------------------------- pure-JAX reference ----------------------------

def reference_forward(X, params):
    x_nchw = jnp.transpose(X, (0, 3, 2, 1)).astype(jnp.float32)
    conv = jax.lax.conv_general_dilated(
        x_nchw, params["w_conv"], window_strides=(2, 2),
        padding=((1, 1), (1, 1)),
        dimension_numbers=("NCHW", "OIHW", "NCHW"))
    conv = jax.nn.relu(conv + params["b_conv"][None, :, None, None])
    flat = conv.reshape(conv.shape[0], -1)
    logits = flat @ params["w_lin"].T + params["b_lin"]
    return jax.nn.softmax(logits, axis=1)


# ------------------------------------ main -----------------------------------

if __name__ == "__main__":
    batch, height, width, channel_in = 2, 16, 16, 4
    F = int(height * width * 6 / 4)  # 384

    key = jax.random.PRNGKey(0)
    k_x, k_wc, k_bc, k_wl, k_bl = jax.random.split(key, 5)

    # input layout: (B, W, H, C_in) so that permute(0,3,2,1) -> NCHW
    X = jax.random.normal(k_x, (batch, width, height, channel_in), dtype=jnp.float32)

    params = {
        "w_conv": 0.1 * jax.random.normal(k_wc, (6, channel_in, 3, 3), dtype=jnp.float32),
        "b_conv": 0.1 * jax.random.normal(k_bc, (6,), dtype=jnp.float32),
        "w_lin": 0.05 * jax.random.normal(k_wl, (8, F), dtype=jnp.float32),
        "b_lin": 0.05 * jax.random.normal(k_bl, (8,), dtype=jnp.float32),
    }

    prep = prepare_params(params, height, width)          # one-time, cacheable weight prep
    fwd = jax.jit(model_forward)

    out = jax.block_until_ready(fwd(X, prep))
    ref = jax.block_until_ready(reference_forward(X, params))

    assert out.shape == (batch, 8), out.shape
    # 1e-3 tolerance: only extra error source vs the f32 reference is the approx
    # reciprocal in the softmax denominator (rel err ~2^-12), well inside this bound.
    err = float(jnp.max(jnp.abs(out - ref)))
    assert jnp.allclose(out, ref, atol=1e-3, rtol=1e-3), err
    print("KERNEL_OK")
</pallas_src>

<mosaic_0001>
module attributes {stable_mosaic.version = 11 : i64} {
  func.func @fused_kernel(%arg0: i32, %arg1: memref<2x1728xf32, #tpu.memory_space<vmem>>, %arg2: memref<1728x384xf32, #tpu.memory_space<vmem>>, %arg3: memref<1x384xf32, #tpu.memory_space<vmem>>, %arg4: memref<384x8xf32, #tpu.memory_space<vmem>>, %arg5: memref<1x8xf32, #tpu.memory_space<vmem>>, %arg6: memref<2x8xf32, #tpu.memory_space<vmem>>) attributes {dimension_semantics = [#tpu.dimension_semantics<arbitrary>], iteration_bounds = array<i64: 1>, scalar_prefetch = 0 : i64, scratch_operands = 0 : i64, tpu.core_type = #tpu.core_type<tc>, window_params = [{pipeline_mode = #tpu.pipeline_mode<synchronous>, transform_indices = @transform_0, window_bounds = array<i64: 2, 1728>}, {pipeline_mode = #tpu.pipeline_mode<synchronous>, transform_indices = @transform_1, window_bounds = array<i64: 1728, 384>}, {pipeline_mode = #tpu.pipeline_mode<synchronous>, transform_indices = @transform_2, window_bounds = array<i64: 1, 384>}, {pipeline_mode = #tpu.pipeline_mode<synchronous>, transform_indices = @transform_3, window_bounds = array<i64: 384, 8>}, {pipeline_mode = #tpu.pipeline_mode<synchronous>, transform_indices = @transform_4, window_bounds = array<i64: 1, 8>}, {pipeline_mode = #tpu.pipeline_mode<synchronous>, transform_indices = @transform_5, window_bounds = array<i64: 2, 8>}]} {
    %c0 = arith.constant 0 : index
    %c0_0 = arith.constant 0 : index
    %0 = vector.load %arg1[%c0, %c0_0] : memref<2x1728xf32, #tpu.memory_space<vmem>>, vector<2x1728xf32>
    %c0_1 = arith.constant 0 : index
    %c0_2 = arith.constant 0 : index
    %1 = vector.load %arg2[%c0_1, %c0_2] : memref<1728x384xf32, #tpu.memory_space<vmem>>, vector<1728x384xf32>
    %cst = arith.constant dense<0.000000e+00> : vector<2x384xf32>
    %2 = tpu.matmul %0, %1, %cst {dimension_numbers = #tpu.dot_dimension_numbers<[1], [0], [0], [1], [0, 0, 1, 1], [], []>} : vector<2x1728xf32>, vector<1728x384xf32>, vector<2x384xf32> -> vector<2x384xf32>
    %c0_3 = arith.constant 0 : index
    %c0_4 = arith.constant 0 : index
    %3 = vector.load %arg3[%c0_3, %c0_4] : memref<1x384xf32, #tpu.memory_space<vmem>>, vector<1x384xf32>
    %4 = vector.broadcast %3 : vector<1x384xf32> to vector<2x384xf32>
    %5 = arith.addf %2, %4 : vector<2x384xf32>
    %cst_5 = arith.constant 0.000000e+00 : f32
    %6 = vector.broadcast %cst_5 : f32 to vector<2x384xf32>
    %7 = arith.maximumf %5, %6 : vector<2x384xf32>
    %c0_6 = arith.constant 0 : index
    %c0_7 = arith.constant 0 : index
    %8 = vector.load %arg4[%c0_6, %c0_7] : memref<384x8xf32, #tpu.memory_space<vmem>>, vector<384x8xf32>
    %cst_8 = arith.constant dense<0.000000e+00> : vector<2x8xf32>
    %9 = tpu.matmul %7, %8, %cst_8 {dimension_numbers = #tpu.dot_dimension_numbers<[1], [0], [0], [1], [0, 0, 1, 1], [], []>} : vector<2x384xf32>, vector<384x8xf32>, vector<2x8xf32> -> vector<2x8xf32>
    %c0_9 = arith.constant 0 : index
    %c0_10 = arith.constant 0 : index
    %10 = vector.load %arg5[%c0_9, %c0_10] : memref<1x8xf32, #tpu.memory_space<vmem>>, vector<1x8xf32>
    %11 = vector.broadcast %10 : vector<1x8xf32> to vector<2x8xf32>
    %12 = arith.addf %9, %11 : vector<2x8xf32>
    %cst_11 = arith.constant dense<0xFF800000> : vector<2xf32>
    %13 = vector.multi_reduction <maximumf>, %12, %cst_11 [1] : vector<2x8xf32> to vector<2xf32>
    %14 = vector.shape_cast %13 : vector<2xf32> to vector<2x1xf32>
    %15 = vector.broadcast %14 : vector<2x1xf32> to vector<2x8xf32>
    %16 = arith.subf %12, %15 : vector<2x8xf32>
    %17 = math.exp %16 : vector<2x8xf32>
    %cst_12 = arith.constant dense<0.000000e+00> : vector<2xf32>
    %18 = vector.multi_reduction <add>, %17, %cst_12 [1] : vector<2x8xf32> to vector<2xf32>
    %19 = vector.shape_cast %18 : vector<2xf32> to vector<2x1xf32>
    %20 = tpu.reciprocal %19 {approx = true} : vector<2x1xf32> -> vector<2x1xf32>
    %21 = vector.broadcast %20 : vector<2x1xf32> to vector<2x8xf32>
    %22 = arith.mulf %17, %21 : vector<2x8xf32>
    %c0_13 = arith.constant 0 : index
    %c0_14 = arith.constant 0 : index
    %23 = vector.load %arg6[%c0_13, %c0_14] : memref<2x8xf32, #tpu.memory_space<vmem>>, vector<2x8xf32>
    tpu.vector_store %arg6[%c0_13, %c0_14], %22 {strides = array<i32>} : memref<2x8xf32, #tpu.memory_space<vmem>>, vector<2x8xf32>,
    return
  }
  func.func @transform_0(%arg0: i32) -> (i32, i32) {
    %c0_i32 = arith.constant 0 : i32
    %c0_i32_0 = arith.constant 0 : i32
    %c0_i32_1 = arith.constant 0 : i32
    return %c0_i32, %c0_i32_0 : i32, i32
  }
  func.func @transform_1(%arg0: i32) -> (i32, i32) {
    %c0_i32 = arith.constant 0 : i32
    %c0_i32_0 = arith.constant 0 : i32
    %c0_i32_1 = arith.constant 0 : i32
    return %c0_i32, %c0_i32_0 : i32, i32
  }
  func.func @transform_2(%arg0: i32) -> (i32, i32) {
    %c0_i32 = arith.constant 0 : i32
    %c0_i32_0 = arith.constant 0 : i32
    %c0_i32_1 = arith.constant 0 : i32
    return %c0_i32, %c0_i32_0 : i32, i32
  }
  func.func @transform_3(%arg0: i32) -> (i32, i32) {
    %c0_i32 = arith.constant 0 : i32
    %c0_i32_0 = arith.constant 0 : i32
    %c0_i32_1 = arith.constant 0 : i32
    return %c0_i32, %c0_i32_0 : i32, i32
  }
  func.func @transform_4(%arg0: i32) -> (i32, i32) {
    %c0_i32 = arith.constant 0 : i32
    %c0_i32_0 = arith.constant 0 : i32
    %c0_i32_1 = arith.constant 0 : i32
    return %c0_i32, %c0_i32_0 : i32, i32
  }
  func.func @transform_5(%arg0: i32) -> (i32, i32) {
    %c0_i32 = arith.constant 0 : i32
    %c0_i32_0 = arith.constant 0 : i32
    %c0_i32_1 = arith.constant 0 : i32
    return %c0_i32, %c0_i32_0 : i32, i32
  }
}

</mosaic_0001>

<bundles_post_ra>
// kernel: model_forward.1
= control target key start
LH: loop header
LB: loop body
LE: loop exit
PB: predicated region body
PF: predicated region fallthrough
CT: control target
= control target key end

     0   :  { %s5330_s0 = inlined_call_operand.vmem [shape: f32[2,1728], index: 0, kind: input, shape index: {}]   ;;  %s5331_s1 = inlined_call_operand.vmem [shape: f32[1728,384], index: 1, kind: input, shape index: {}]   ;;  %s5332_s2 = inlined_call_operand.vmem [shape: f32[1,384], index: 2, kind: input, shape index: {}]   ;;  %s5333_s3 = inlined_call_operand.vmem [shape: f32[384,8], index: 3, kind: input, shape index: {}]   ;;  %s5334_s4 = inlined_call_operand.vmem [shape: f32[1,8], index: 4, kind: input, shape index: {}]   ;;  %s5335_s5 = inlined_call_operand.hbm [shape: f32[2,8], index: 5, kind: output, shape index: {}]  }
   0x1   :  { %v26_v0 = vld [vmem:[%s5331_s1 + $0x8] sm:$0xff]  ;;  %v29_v1 = vld [vmem:[%s5331_s1 + $0x20] sm:$0xff]  ;;  %v28_v6 = vld [vmem:[%s5331_s1 + $0x18] sm:$0xff] }
   0x2   :  { %v122_v2 = vld [vmem:[%s5331_s1 + $0x308] sm:$0xff]  ;;  %v2282_v3 = vpack.c.bf16 %v29_v1, %v26_v0  ;;  %v125_v4 = vld [vmem:[%s5331_s1 + $0x320] sm:$0xff]  ;;  %v124_v10 = vld [vmem:[%s5331_s1 + $0x318] sm:$0xff] }
   0x3   :  { %v25_v5 = vld [vmem:[%s5331_s1] sm:$0xff]  ;;  %v2346_v7 = vpack.c.bf16 %v125_v4, %v122_v2  ;;  %v32_v11 = vld [vmem:[%s5331_s1 + $0x38] sm:$0xff]  ;;  %v35_v13 = vld [vmem:[%s5331_s1 + $0x50] sm:$0xff] }
   0x4   :  { %v2284_v8 = vpack.c.bf16 %v28_v6, %v25_v5  ;;  %v121_v9 = vld [vmem:[%s5331_s1 + $0x300] sm:$0xff]  ;;  %2283 = vmatprep.subr.bf16.mxu1 %v2282_v3  ;;  %v128_v14 = vld [vmem:[%s5331_s1 + $0x338] sm:$0xff]  ;;  %v131_v15 = vld [vmem:[%s5331_s1 + $0x350] sm:$0xff]  ;;  %v2286_v16 = vpack.c.bf16 %v35_v13, %v32_v11 }
   0x5   :  { %v2348_v12 = vpack.c.bf16 %v124_v10, %v121_v9  ;;  %2347 = vmatprep.subr.bf16.mxu0 %v2346_v7  ;;  %v2350_v17 = vpack.c.bf16 %v131_v15, %v128_v14  ;;  %v31_v18 = vld [vmem:[%s5331_s1 + $0x30] sm:$0xff]  ;;  %v34_v19 = vld [vmem:[%s5331_s1 + $0x48] sm:$0xff]  ;;  %v41_v24 = vld [vmem:[%s5331_s1 + $0x80] sm:$0xff] }
   0x6   :  { %2285 = vmatpush1.bf16.msra.mxu1 %v2284_v8  ;;  %v127_v20 = vld [vmem:[%s5331_s1 + $0x330] sm:$0xff]  ;;  %v2288_v21 = vpack.c.bf16 %v34_v19, %v31_v18  ;;  %v130_v22 = vld [vmem:[%s5331_s1 + $0x348] sm:$0xff]  ;;  %v137_v28 = vld [vmem:[%s5331_s1 + $0x380] sm:$0xff] }
   0x7   :  { %2349 = vmatpush1.bf16.msra.mxu0 %v2348_v12  ;;  %v38_v23 = vld [vmem:[%s5331_s1 + $0x68] sm:$0xff]  ;;  %2287 = vmatprep.subr.bf16.mxu1 %v2286_v16  ;;  %v2352_v25 = vpack.c.bf16 %v130_v22, %v127_v20  ;;  %v37_v29 = vld [vmem:[%s5331_s1 + $0x60] sm:$0xff]  ;;  %v40_v31 = vld [vmem:[%s5331_s1 + $0x78] sm:$0xff] }
   0x8   :  { %2351 = vmatprep.subr.bf16.mxu0 %v2350_v17  ;;  %v2290_v26 = vpack.c.bf16 %v41_v24, %v38_v23  ;;  %v134_v27 = vld [vmem:[%s5331_s1 + $0x368] sm:$0xff]  ;;  %v133_v32 = vld [vmem:[%s5331_s1 + $0x360] sm:$0xff]  ;;  %v136_v33 = vld [vmem:[%s5331_s1 + $0x378] sm:$0xff]  ;;  %v2292_v34 = vpack.c.bf16 %v40_v31, %v37_v29 }
   0x9   :  { %v2354_v30 = vpack.c.bf16 %v137_v28, %v134_v27  ;;  %v44_v35 = vld [vmem:[%s5331_s1 + $0x98] sm:$0xff]  ;;  %v47_v36 = vld [vmem:[%s5331_s1 + $0xb0] sm:$0xff]  ;;  %v2356_v38 = vpack.c.bf16 %v136_v33, %v133_v32  ;;  %v46_v42 = vld [vmem:[%s5331_s1 + $0xa8] sm:$0xff] }
   0xa   :  { %2289 = vmatpush1.bf16.msra.mxu1 %v2288_v21  ;;  %v140_v37 = vld [vmem:[%s5331_s1 + $0x398] sm:$0xff]  ;;  %v2294_v39 = vpack.c.bf16 %v47_v36, %v44_v35  ;;  %v143_v40 = vld [vmem:[%s5331_s1 + $0x3b0] sm:$0xff]  ;;  %v142_v45 = vld [vmem:[%s5331_s1 + $0x3a8] sm:$0xff] }
   0xb   :  { %2353 = vmatpush1.bf16.msra.mxu0 %v2352_v25  ;;  %2291 = vmatprep.subr.bf16.mxu1 %v2290_v26  ;;  %v43_v41 = vld [vmem:[%s5331_s1 + $0x90] sm:$0xff]  ;;  %v2358_v43 = vpack.c.bf16 %v143_v40, %v140_v37  ;;  %v50_v46 = vld [vmem:[%s5331_s1 + $0xc8] sm:$0xff]  ;;  %v53_v47 = vld [vmem:[%s5331_s1 + $0xe0] sm:$0xff] }
   0xc   :  { %2355 = vmatprep.subr.bf16.mxu0 %v2354_v30  ;;  %v139_v44 = vld [vmem:[%s5331_s1 + $0x390] sm:$0xff]  ;;  %v146_v48 = vld [vmem:[%s5331_s1 + $0x3c8] sm:$0xff]  ;;  %v149_v49 = vld [vmem:[%s5331_s1 + $0x3e0] sm:$0xff]  ;;  %v2296_v50 = vpack.c.bf16 %v46_v42, %v43_v41  ;;  %v2298_v52 = vpack.c.bf16 %v53_v47, %v50_v46  ;;  %v675_v46 = vlaneseq  ;;  %v3048_v47 = vmov 1983009808  }
   0xd   :  { %v2360_v51 = vpack.c.bf16 %v142_v45, %v139_v44  ;;  %v49_v53 = vld [vmem:[%s5331_s1 + $0xc0] sm:$0xff]  ;;  %v52_v54 = vld [vmem:[%s5331_s1 + $0xd8] sm:$0xff]  ;;  %v2362_v56 = vpack.c.bf16 %v149_v49, %v146_v48  ;;  %v59_v59 = vld [vmem:[%s5331_s1 + $0x110] sm:$0xff]  ;;  %v696_v48 = vunpack.c.l.s4 %v3048_v47 }
   0xe   :  { %2293 = vmatpush1.bf16.msra.mxu1 %v2292_v34  ;;  %v145_v55 = vld [vmem:[%s5331_s1 + $0x3c0] sm:$0xff]  ;;  %v148_v57 = vld [vmem:[%s5331_s1 + $0x3d8] sm:$0xff]  ;;  %v155_v61 = vld [vmem:[%s5331_s1 + $0x410] sm:$0xff]  ;;  %v2300_v62 = vpack.c.bf16 %v52_v54, %v49_v53 }
   0xf   :  { %2357 = vmatpush1.bf16.msra.mxu0 %v2356_v38  ;;  %2295 = vmatprep.subr.bf16.mxu1 %v2294_v39  ;;  %v56_v58 = vld [vmem:[%s5331_s1 + $0xf8] sm:$0xff]  ;;  %v2364_v63 = vpack.c.bf16 %v148_v57, %v145_v55  ;;  %v55_v1 = vld [vmem:[%s5331_s1 + $0xf0] sm:$0xff]  ;;  %v58_v2 = vld [vmem:[%s5331_s1 + $0x108] sm:$0xff] }
  0x10   :  { %2359 = vmatprep.subr.bf16.mxu0 %v2358_v43  ;;  %v152_v60 = vld [vmem:[%s5331_s1 + $0x3f8] sm:$0xff]  ;;  %v2302_v0 = vpack.c.bf16 %v59_v59, %v56_v58  ;;  %v151_v3 = vld [vmem:[%s5331_s1 + $0x3f0] sm:$0xff]  ;;  %v154_v5 = vld [vmem:[%s5331_s1 + $0x408] sm:$0xff]  ;;  %v2304_v10 = vpack.c.bf16 %v58_v2, %v55_v1 }
  0x11   :  { %v2366_v4 = vpack.c.bf16 %v155_v61, %v152_v60  ;;  %v62_v6 = vld [vmem:[%s5331_s1 + $0x128] sm:$0xff]  ;;  %v65_v7 = vld [vmem:[%s5331_s1 + $0x140] sm:$0xff]  ;;  %v2368_v11 = vpack.c.bf16 %v154_v5, %v151_v3  ;;  %v64_v14 = vld [vmem:[%s5331_s1 + $0x138] sm:$0xff]  ;;  %v3335_v61 = vshrl.u32 %v675_v46, 7 }
  0x12   :  { %2297 = vmatpush1.bf16.msra.mxu1 %v2296_v50  ;;  %v158_v8 = vld [vmem:[%s5331_s1 + $0x428] sm:$0xff]  ;;  %v161_v9 = vld [vmem:[%s5331_s1 + $0x440] sm:$0xff]  ;;  %v2306_v12 = vpack.c.bf16 %v65_v7, %v62_v6  ;;  %v160_v17 = vld [vmem:[%s5331_s1 + $0x438] sm:$0xff] }
  0x13   :  { %2361 = vmatpush1.bf16.msra.mxu0 %v2360_v51  ;;  %2299 = vmatprep.subr.bf16.mxu1 %v2298_v52  ;;  %v61_v13 = vld [vmem:[%s5331_s1 + $0x120] sm:$0xff]  ;;  %v2370_v16 = vpack.c.bf16 %v161_v9, %v158_v8  ;;  %v68_v18 = vld [vmem:[%s5331_s1 + $0x158] sm:$0xff]  ;;  %v71_v19 = vld [vmem:[%s5331_s1 + $0x170] sm:$0xff] }
  0x14   :  { %2363 = vmatprep.subr.bf16.mxu0 %v2362_v56  ;;  %v157_v15 = vld [vmem:[%s5331_s1 + $0x420] sm:$0xff]  ;;  %v164_v20 = vld [vmem:[%s5331_s1 + $0x458] sm:$0xff]  ;;  %v167_v21 = vld [vmem:[%s5331_s1 + $0x470] sm:$0xff]  ;;  %v2308_v22 = vpack.c.bf16 %v64_v14, %v61_v13  ;;  %v2310_v24 = vpack.c.bf16 %v71_v19, %v68_v18 }
  0x15   :  { %v2372_v23 = vpack.c.bf16 %v160_v17, %v157_v15  ;;  %v67_v25 = vld [vmem:[%s5331_s1 + $0x150] sm:$0xff]  ;;  %v70_v26 = vld [vmem:[%s5331_s1 + $0x168] sm:$0xff]  ;;  %v2374_v28 = vpack.c.bf16 %v167_v21, %v164_v20  ;;  %v77_v31 = vld [vmem:[%s5331_s1 + $0x1a0] sm:$0xff] }
  0x16   :  { %2301 = vmatpush1.bf16.msra.mxu1 %v2300_v62  ;;  %v163_v27 = vld [vmem:[%s5331_s1 + $0x450] sm:$0xff]  ;;  %v166_v29 = vld [vmem:[%s5331_s1 + $0x468] sm:$0xff]  ;;  %v173_v33 = vld [vmem:[%s5331_s1 + $0x4a0] sm:$0xff]  ;;  %v2312_v34 = vpack.c.bf16 %v70_v26, %v67_v25  ;;  %v697_v62 = vunpack.c.0.s8 %v696_v48 }
  0x17   :  { %2365 = vmatpush1.bf16.msra.mxu0 %v2364_v63  ;;  %2303 = vmatprep.subr.bf16.mxu1 %v2302_v0  ;;  %v74_v30 = vld [vmem:[%s5331_s1 + $0x188] sm:$0xff]  ;;  %v2376_v35 = vpack.c.bf16 %v166_v29, %v163_v27  ;;  %v73_v37 = vld [vmem:[%s5331_s1 + $0x180] sm:$0xff]  ;;  %v76_v38 = vld [vmem:[%s5331_s1 + $0x198] sm:$0xff] }
  0x18   :  { %2367 = vmatprep.subr.bf16.mxu0 %v2366_v4  ;;  %v170_v32 = vld [vmem:[%s5331_s1 + $0x488] sm:$0xff]  ;;  %v2314_v36 = vpack.c.bf16 %v77_v31, %v74_v30  ;;  %v169_v39 = vld [vmem:[%s5331_s1 + $0x480] sm:$0xff]  ;;  %v172_v41 = vld [vmem:[%s5331_s1 + $0x498] sm:$0xff]  ;;  %v2316_v49 = vpack.c.bf16 %v76_v38, %v73_v37 }
  0x19   :  { %v2378_v40 = vpack.c.bf16 %v173_v33, %v170_v32  ;;  %v80_v42 = vld [vmem:[%s5331_s1 + $0x1b8] sm:$0xff]  ;;  %v83_v43 = vld [vmem:[%s5331_s1 + $0x1d0] sm:$0xff]  ;;  %v2380_v50 = vpack.c.bf16 %v172_v41, %v169_v39  ;;  %v82_v53 = vld [vmem:[%s5331_s1 + $0x1c8] sm:$0xff] }
  0x1a   :  { %2305 = vmatpush1.bf16.msra.mxu1 %v2304_v10  ;;  %v176_v44 = vld [vmem:[%s5331_s1 + $0x4b8] sm:$0xff]  ;;  %v179_v45 = vld [vmem:[%s5331_s1 + $0x4d0] sm:$0xff]  ;;  %v2318_v51 = vpack.c.bf16 %v83_v43, %v80_v42  ;;  %v178_v56 = vld [vmem:[%s5331_s1 + $0x4c8] sm:$0xff] }
  0x1b   :  { %2369 = vmatpush1.bf16.msra.mxu0 %v2368_v11  ;;  %2307 = vmatprep.subr.bf16.mxu1 %v2306_v12  ;;  %v79_v52 = vld [vmem:[%s5331_s1 + $0x1b0] sm:$0xff]  ;;  %v2382_v55 = vpack.c.bf16 %v179_v45, %v176_v44  ;;  %v86_v57 = vld [vmem:[%s5331_s1 + $0x1e8] sm:$0xff]  ;;  %v89_v58 = vld [vmem:[%s5331_s1 + $0x200] sm:$0xff]  ;;  %v3362_v11 = vsub.s32 %v697_v62, %v3335_v61 }
  0x1c   :  { %2371 = vmatprep.subr.bf16.mxu0 %v2370_v16  ;;  %v175_v54 = vld [vmem:[%s5331_s1 + $0x4b0] sm:$0xff]  ;;  %v182_v59 = vld [vmem:[%s5331_s1 + $0x4e8] sm:$0xff]  ;;  %v185_v60 = vld [vmem:[%s5331_s1 + $0x500] sm:$0xff]  ;;  %v2320_v63 = vpack.c.bf16 %v82_v53, %v79_v52  ;;  %v2322_v1 = vpack.c.bf16 %v89_v58, %v86_v57 }
  0x1d   :  { %v2384_v0 = vpack.c.bf16 %v178_v56, %v175_v54  ;;  %v85_v2 = vld [vmem:[%s5331_s1 + $0x1e0] sm:$0xff]  ;;  %v88_v3 = vld [vmem:[%s5331_s1 + $0x1f8] sm:$0xff]  ;;  %v2386_v5 = vpack.c.bf16 %v185_v60, %v182_v59  ;;  %v95_v8 = vld [vmem:[%s5331_s1 + $0x230] sm:$0xff] }
  0x1e   :  { %2309 = vmatpush1.bf16.msra.mxu1 %v2308_v22  ;;  %v181_v4 = vld [vmem:[%s5331_s1 + $0x4e0] sm:$0xff]  ;;  %v184_v6 = vld [vmem:[%s5331_s1 + $0x4f8] sm:$0xff]  ;;  %v191_v10 = vld [vmem:[%s5331_s1 + $0x530] sm:$0xff]  ;;  %v2324_v12 = vpack.c.bf16 %v88_v3, %v85_v2 }
  0x1f   :  { %2373 = vmatpush1.bf16.msra.mxu0 %v2372_v23  ;;  %2311 = vmatprep.subr.bf16.mxu1 %v2310_v24  ;;  %v92_v7 = vld [vmem:[%s5331_s1 + $0x218] sm:$0xff]  ;;  %v91_v13 = vld [vmem:[%s5331_s1 + $0x210] sm:$0xff]  ;;  %v2388_v14 = vpack.c.bf16 %v184_v6, %v181_v4  ;;  %v94_v16 = vld [vmem:[%s5331_s1 + $0x228] sm:$0xff] }
  0x20   :  { %2375 = vmatprep.subr.bf16.mxu0 %v2374_v28  ;;  %v188_v9 = vld [vmem:[%s5331_s1 + $0x518] sm:$0xff]  ;;  %v2326_v15 = vpack.c.bf16 %v95_v8, %v92_v7  ;;  %v187_v17 = vld [vmem:[%s5331_s1 + $0x510] sm:$0xff]  ;;  %v190_v18 = vld [vmem:[%s5331_s1 + $0x528] sm:$0xff]  ;;  %v2328_v27 = vpack.c.bf16 %v94_v16, %v91_v13 }
  0x21   :  { %v2390_v19 = vpack.c.bf16 %v191_v10, %v188_v9  ;;  %v98_v20 = vld [vmem:[%s5331_s1 + $0x248] sm:$0xff]  ;;  %v101_v21 = vld [vmem:[%s5331_s1 + $0x260] sm:$0xff]  ;;  %v2392_v28 = vpack.c.bf16 %v190_v18, %v187_v17  ;;  %v100_v31 = vld [vmem:[%s5331_s1 + $0x258] sm:$0xff] }
  0x22   :  { %2313 = vmatpush1.bf16.msra.mxu1 %v2312_v34  ;;  %v21_v22 = vld [vmem:[%s5330_s0] sm:$0xff]  ;;  %v194_v23 = vld [vmem:[%s5331_s1 + $0x548] sm:$0xff]  ;;  %v2330_v29 = vpack.c.bf16 %v101_v21, %v98_v20  ;;  %v104_v37 = vld [vmem:[%s5331_s1 + $0x278] sm:$0xff] }
  0x23   :  { %2377 = vmatpush1.bf16.msra.mxu0 %v2376_v35  ;;  %2315 = vmatprep.subr.bf16.mxu1 %v2314_v36  ;;  %v197_v24 = vld [vmem:[%s5331_s1 + $0x560] sm:$0xff]  ;;  %v3392_v25 = vrot.slane %v21_v22, %v3362_v11  ;;  %v694_v26 = vcombine.high %v21_v22, %v21_v22  ;;  %v196_v36 = vld [vmem:[%s5331_s1 + $0x558] sm:$0xff]  ;;  %v107_v38 = vld [vmem:[%s5331_s1 + $0x290] sm:$0xff] }
  0x24   :  { %2379 = vmatprep.subr.bf16.mxu0 %v2378_v40  ;;  %v97_v30 = vld [vmem:[%s5331_s1 + $0x240] sm:$0xff]  ;;  %v2394_v35 = vpack.c.bf16 %v197_v24, %v194_v23  ;;  %v200_v39 = vld [vmem:[%s5331_s1 + $0x578] sm:$0xff]  ;;  %v203_v40 = vld [vmem:[%s5331_s1 + $0x590] sm:$0xff]  ;;  %v2334_v44 = vpack.c.bf16 %v107_v38, %v104_v37 }
  0x25   :  { %v193_v32 = vld [vmem:[%s5331_s1 + $0x540] sm:$0xff]  ;;  %v3405_v33 = vcombine.high %v3392_v25, %v3392_v25  ;;  %v3408_v34 = vrot.slane %v694_v26, %v3362_v11  ;;  %v2332_v42 = vpack.c.bf16 %v100_v31, %v97_v30  ;;  %v103_v45 = vld [vmem:[%s5331_s1 + $0x270] sm:$0xff]  ;;  %v106_v46 = vld [vmem:[%s5331_s1 + $0x288] sm:$0xff]  ;;  %v2398_v48 = vpack.c.bf16 %v203_v40, %v200_v39 }
  0x26   :  { %2317 = vmatpush1.bf16.msra.mxu1 %v2316_v49  ;;  %v2396_v43 = vpack.c.bf16 %v196_v36, %v193_v32  ;;  %v199_v47 = vld [vmem:[%s5331_s1 + $0x570] sm:$0xff]  ;;  %v202_v49 = vld [vmem:[%s5331_s1 + $0x588] sm:$0xff]  ;;  %v209_v53 = vld [vmem:[%s5331_s1 + $0x5c0] sm:$0xff]  ;;  %v2336_v54 = vpack.c.bf16 %v106_v46, %v103_v45 }
  0x27   :  { %2381 = vmatpush1.bf16.msra.mxu0 %v2380_v50  ;;  %2319 = vmatprep.subr.bf16.mxu1 %v2318_v51  ;;  %v3428_v41 = vcombine.high %v3408_v34, %v3408_v34  ;;  %v110_v50 = vld [vmem:[%s5331_s1 + $0x2a8] sm:$0xff]  ;;  %v113_v51 = vld [vmem:[%s5331_s1 + $0x2c0] sm:$0xff]  ;;  %v112_v58 = vld [vmem:[%s5331_s1 + $0x2b8] sm:$0xff] }
  0x28   :  { %2383 = vmatprep.subr.bf16.mxu0 %v2382_v55  ;;  %833 = vmatprep.mubr.f32.mxu1 %v3405_v33  ;;  %v206_v52 = vld [vmem:[%s5331_s1 + $0x5a8] sm:$0xff]  ;;  %v2400_v55 = vpack.c.bf16 %v202_v49, %v199_v47  ;;  %v2338_v56 = vpack.c.bf16 %v113_v51, %v110_v50  ;;  %v109_v57 = vld [vmem:[%s5331_s1 + $0x2a0] sm:$0xff]  ;;  %v208_v62 = vld [vmem:[%s5331_s1 + $0x5b8] sm:$0xff] }
  0x29   :  { %904 = vmatprep.mubr.f32.mxu0 %v3428_v41  ;;  %v205_v59 = vld [vmem:[%s5331_s1 + $0x5a0] sm:$0xff]  ;;  %v2402_v60 = vpack.c.bf16 %v209_v53, %v206_v52  ;;  %v215_v2 = vld [vmem:[%s5331_s1 + $0x5f0] sm:$0xff]  ;;  %v2340_v3 = vpack.c.bf16 %v112_v58, %v109_v57  ;;  %v118_v7 = vld [vmem:[%s5331_s1 + $0x2e8] sm:$0xff] }
  0x2a   :  { %2321 = vmatpush1.bf16.msra.mxu1 %v2320_v63  ;;  %v116_v63 = vld [vmem:[%s5331_s1 + $0x2d8] sm:$0xff]  ;;  %v2404_v4 = vpack.c.bf16 %v208_v62, %v205_v59  ;;  %v115_v6 = vld [vmem:[%s5331_s1 + $0x2d0] sm:$0xff]  ;;  %v214_v10 = vld [vmem:[%s5331_s1 + $0x5e8] sm:$0xff] }
  0x2b   :  { %2385 = vmatpush1.bf16.msra.mxu0 %v2384_v0  ;;  %2323 = vmatprep.subr.bf16.mxu1 %v2322_v1  ;;  %v119_v0 = vld [vmem:[%s5331_s1 + $0x2f0] sm:$0xff]  ;;  %v212_v1 = vld [vmem:[%s5331_s1 + $0x5d8] sm:$0xff]  ;;  %v78_v13 = vld [vmem:[%s5331_s1 + $0x1a8] sm:$0xff]  ;;  %v2344_v16 = vpack.c.bf16 %v118_v7, %v115_v6 }
  0x2c   :  { %2387 = vmatprep.subr.bf16.mxu0 %v2386_v5  ;;  %v2342_v5 = vpack.c.bf16 %v119_v0, %v116_v63  ;;  %v211_v8 = vld [vmem:[%s5331_s1 + $0x5d0] sm:$0xff]  ;;  %v2406_v9 = vpack.c.bf16 %v215_v2, %v212_v1  ;;  %v30_v21 = vld [vmem:[%s5331_s1 + $0x28] sm:$0xff]  ;;  %v220_v23 = vld [vmem:[%s5331_s1 + $0x618] sm:$0xff] }
  0x2d   :  { %v2408_v17 = vpack.c.bf16 %v214_v10, %v211_v8  ;;  %v27_v20 = vld [vmem:[%s5331_s1 + $0x10] sm:$0xff]  ;;  %v81_v24 = vld [vmem:[%s5331_s1 + $0x1c0] sm:$0xff]  ;;  %v84_v26 = vld [vmem:[%s5331_s1 + $0x1d8] sm:$0xff] }
  0x2e   :  { %2325 = vmatpush1.bf16.msra.mxu1 %v2324_v12  ;;  %v75_v12 = vld [vmem:[%s5331_s1 + $0x190] sm:$0xff]  ;;  %v2718_v31 = vpack.c.bf16 %v84_v26, %v81_v24  ;;  %v36_v36 = vld [vmem:[%s5331_s1 + $0x58] sm:$0xff]  ;;  %v226_v38 = vld [vmem:[%s5331_s1 + $0x648] sm:$0xff] }
  0x2f   :  { %2389 = vmatpush1.bf16.msra.mxu0 %v2388_v14  ;;  %2327 = vmatprep.subr.bf16.mxu1 %v2326_v15  ;;  %v218_v14 = vld [vmem:[%s5331_s1 + $0x608] sm:$0xff]  ;;  %v221_v15 = vld [vmem:[%s5331_s1 + $0x620] sm:$0xff]  ;;  %v2714_v18 = vpack.c.bf16 %v78_v13, %v75_v12  ;;  %v223_v32 = vld [vmem:[%s5331_s1 + $0x630] sm:$0xff] }
  0x30   :  { %2391 = vmatprep.subr.bf16.mxu0 %v2390_v19  ;;  %v217_v19 = vld [vmem:[%s5331_s1 + $0x600] sm:$0xff]  ;;  %v2410_v22 = vpack.c.bf16 %v221_v15, %v218_v14  ;;  %v87_v39 = vld [vmem:[%s5331_s1 + $0x1f0] sm:$0xff]  ;;  %v90_v40 = vld [vmem:[%s5331_s1 + $0x208] sm:$0xff]  ;;  %v2416_v45 = vpack.c.bf16 %v226_v38, %v223_v32 }
  0x31   :  { %v2412_v30 = vpack.c.bf16 %v220_v23, %v217_v19  ;;  %v2722_v46 = vpack.c.bf16 %v90_v40, %v87_v39  ;;  %v229_v47 = vld [vmem:[%s5331_s1 + $0x660] sm:$0xff]  ;;  %v42_v49 = vld [vmem:[%s5331_s1 + $0x88] sm:$0xff]  ;;  %v232_v51 = vld [vmem:[%s5331_s1 + $0x678] sm:$0xff] }
  0x32   :  { %2329 = vmatpush1.bf16.msra.mxu1 %v2328_v27  ;;  %v224_v27 = vld [vmem:[%s5331_s1 + $0x638] sm:$0xff]  ;;  %v93_v52 = vld [vmem:[%s5331_s1 + $0x220] sm:$0xff]  ;;  %v2420_v57 = vpack.c.bf16 %v232_v51, %v229_v47  ;;  %v235_v59 = vld [vmem:[%s5331_s1 + $0x690] sm:$0xff] }
  0x33   :  { %2393 = vmatpush1.bf16.msra.mxu0 %v2392_v28  ;;  %2331 = vmatprep.subr.bf16.mxu1 %v2330_v29  ;;  %v227_v28 = vld [vmem:[%s5331_s1 + $0x650] sm:$0xff]  ;;  %v2716_v29 = vpack.c.bf16 %v30_v21, %v27_v20  ;;  %v96_v53 = vld [vmem:[%s5331_s1 + $0x238] sm:$0xff]  ;;  %v238_v63 = vld [vmem:[%s5331_s1 + $0x6a8] sm:$0xff] }
  0x34   :  { %2395 = vmatprep.subr.bf16.mxu0 %v2394_v35  ;;  %v33_v35 = vld [vmem:[%s5331_s1 + $0x40] sm:$0xff]  ;;  %v2414_v37 = vpack.c.bf16 %v227_v28, %v224_v27  ;;  %v2726_v58 = vpack.c.bf16 %v96_v53, %v93_v52  ;;  %v99_v0 = vld [vmem:[%s5331_s1 + $0x250] sm:$0xff]  ;;  %v102_v1 = vld [vmem:[%s5331_s1 + $0x268] sm:$0xff] }
  0x35   :  { %v242_v2 = vld [vmem:[%s5331_s1 + $0x6c8] sm:$0xff]  ;;  %v2730_v6 = vpack.c.bf16 %v102_v1, %v99_v0  ;;  %v241_v7 = vld [vmem:[%s5331_s1 + $0x6c0] sm:$0xff]  ;;  %v51_v8 = vld [vmem:[%s5331_s1 + $0xd0] sm:$0xff] }
  0x36   :  { %2333 = vmatpush1.bf16.msra.mxu1 %v2332_v42  ;;  %v230_v42 = vld [vmem:[%s5331_s1 + $0x668] sm:$0xff]  ;;  %v244_v12 = vld [vmem:[%s5331_s1 + $0x6d8] sm:$0xff]  ;;  %v105_v13 = vld [vmem:[%s5331_s1 + $0x280] sm:$0xff] }
  0x37   :  { %2397 = vmatpush1.bf16.msra.mxu0 %v2396_v43  ;;  %2335 = vmatprep.subr.bf16.mxu1 %v2334_v44  ;;  %v233_v43 = vld [vmem:[%s5331_s1 + $0x680] sm:$0xff]  ;;  %v2720_v44 = vpack.c.bf16 %v36_v36, %v33_v35  ;;  %v108_v14 = vld [vmem:[%s5331_s1 + $0x298] sm:$0xff]  ;;  %v247_v20 = vld [vmem:[%s5331_s1 + $0x6f0] sm:$0xff] }
  0x38   :  { %2399 = vmatprep.subr.bf16.mxu0 %v2398_v48  ;;  %v39_v48 = vld [vmem:[%s5331_s1 + $0x70] sm:$0xff]  ;;  %v2418_v50 = vpack.c.bf16 %v233_v43, %v230_v42  ;;  %v248_v15 = vld [vmem:[%s5331_s1 + $0x6f8] sm:$0xff]  ;;  %v2734_v19 = vpack.c.bf16 %v108_v14, %v105_v13  ;;  %v57_v21 = vld [vmem:[%s5331_s1 + $0x100] sm:$0xff] }
  0x39   :  { %v250_v24 = vld [vmem:[%s5331_s1 + $0x708] sm:$0xff]  ;;  %v111_v26 = vld [vmem:[%s5331_s1 + $0x2b0] sm:$0xff]  ;;  %v256_v40 = vld [vmem:[%s5331_s1 + $0x738] sm:$0xff] }
  0x3a   :  { %2337 = vmatpush1.bf16.msra.mxu1 %v2336_v54  ;;  %v236_v54 = vld [vmem:[%s5331_s1 + $0x698] sm:$0xff]  ;;  %v114_v27 = vld [vmem:[%s5331_s1 + $0x2c8] sm:$0xff]  ;;  %v2432_v32 = vpack.c.bf16 %v250_v24, %v247_v20  ;;  %v63_v36 = vld [vmem:[%s5331_s1 + $0x130] sm:$0xff] }
  0x3b   :  { %2401 = vmatpush1.bf16.msra.mxu0 %v2400_v55  ;;  %2339 = vmatprep.subr.bf16.mxu1 %v2338_v56  ;;  %v239_v55 = vld [vmem:[%s5331_s1 + $0x6b0] sm:$0xff]  ;;  %v2724_v56 = vpack.c.bf16 %v42_v49, %v39_v48  ;;  %v254_v28 = vld [vmem:[%s5331_s1 + $0x728] sm:$0xff]  ;;  %v2738_v35 = vpack.c.bf16 %v114_v27, %v111_v26  ;;  %v117_v42 = vld [vmem:[%s5331_s1 + $0x2e0] sm:$0xff] }
  0x3c   :  { %2403 = vmatprep.subr.bf16.mxu0 %v2402_v60  ;;  %v48_v60 = vld [vmem:[%s5331_s1 + $0xb8] sm:$0xff]  ;;  %v2422_v62 = vpack.c.bf16 %v239_v55, %v236_v54  ;;  %v3662_v38 = vld [vmem:[%s5330_s0 + $0x8] sm:$0xff]  ;;  %v259_v51 = vld [vmem:[%s5331_s1 + $0x750] sm:$0xff] }
  0x3d   :  { %v120_v43 = vld [vmem:[%s5331_s1 + $0x2f8] sm:$0xff]  ;;  %v69_v52 = vld [vmem:[%s5331_s1 + $0x160] sm:$0xff]  ;;  %v262_v55 = vld [vmem:[%s5331_s1 + $0x768] sm:$0xff] }
  0x3e   :  { %2341 = vmatpush1.bf16.msra.mxu1 %v2340_v3  ;;  %v245_v3 = vld [vmem:[%s5331_s1 + $0x6e0] sm:$0xff]  ;;  %v72_v53 = vld [vmem:[%s5331_s1 + $0x178] sm:$0xff]  ;;  %v123_v0 = vld [vmem:[%s5331_s1 + $0x310] sm:$0xff] }
  0x3f   :  { %2405 = vmatpush1.bf16.msra.mxu0 %v2404_v4  ;;  %2343 = vmatprep.subr.bf16.mxu1 %v2342_v5  ;;  %v2424_v5 = vpack.c.bf16 %v238_v63, %v235_v59  ;;  %v2426_v10 = vpack.c.bf16 %v245_v3, %v242_v2  ;;  %v269_v59 = vld [vmem:[%s5331_s1 + $0x7a0] sm:$0xff]  ;;  %v126_v1 = vld [vmem:[%s5331_s1 + $0x328] sm:$0xff]  ;;  %v268_v3 = vld [vmem:[%s5331_s1 + $0x798] sm:$0xff] }
  0x40   :  { %2407 = vmatprep.subr.bf16.mxu0 %v2406_v9  ;;  %v54_v9 = vld [vmem:[%s5331_s1 + $0xe8] sm:$0xff]  ;;  %v265_v63 = vld [vmem:[%s5331_s1 + $0x780] sm:$0xff]  ;;  %v132_v14 = vld [vmem:[%s5331_s1 + $0x358] sm:$0xff] }
  0x41   :  { %v129_v13 = vld [vmem:[%s5331_s1 + $0x340] sm:$0xff]  ;;  %v135_v24 = vld [vmem:[%s5331_s1 + $0x370] sm:$0xff]  ;;  %v138_v26 = vld [vmem:[%s5331_s1 + $0x388] sm:$0xff] }
  0x42   :  { %2345 = vmatpush1.bf16.msra.mxu1 %v2344_v16  ;;  %v251_v16 = vld [vmem:[%s5331_s1 + $0x710] sm:$0xff]  ;;  %v281_v20 = vld [vmem:[%s5331_s1 + $0x800] sm:$0xff] }
  0x43   :  { %2409 = vmatpush1.bf16.msra.mxu0 %v2408_v17  ;;  %2715 = vmatprep.subr.bf16.mxu1 %v2714_v18  ;;  %v2732_v17 = vpack.c.bf16 %v54_v9, %v51_v8  ;;  %v2428_v18 = vpack.c.bf16 %v244_v12, %v241_v7  ;;  %v2430_v23 = vpack.c.bf16 %v251_v16, %v248_v15  ;;  %v275_v7 = vld [vmem:[%s5331_s1 + $0x7d0] sm:$0xff]  ;;  %v274_v16 = vld [vmem:[%s5331_s1 + $0x7c8] sm:$0xff] }
  0x44   :  { %2411 = vmatprep.subr.bf16.mxu0 %v2410_v22  ;;  %v60_v22 = vld [vmem:[%s5331_s1 + $0x118] sm:$0xff]  ;;  %v2748_v8 = vpack.c.bf16 %v126_v1, %v123_v0  ;;  %v2444_v9 = vpack.c.bf16 %v268_v3, %v265_v63  ;;  %v271_v12 = vld [vmem:[%s5331_s1 + $0x7b0] sm:$0xff] }
  0x45   :  { %834 = vmatmul.mubr.f32.vlgmr.msra.gmra.mrb[0].mxu1 %v3392_v25  ;;  %v295_v1 = vld [vmem:[%s5331_s1 + $0x870] sm:$0xff]  ;;  %v156_v3 = vld [vmem:[%s5331_s1 + $0x418] sm:$0xff] }
  0x46   :  { %905 = vmatmul.mubr.f32.vlgmr.msra.gmra.mrb[0].mxu0 %v3408_v34  ;;  %2717 = vmatpush3.bf16.msra.mxu1 %v2716_v29  ;;  %v257_v29 = vld [vmem:[%s5331_s1 + $0x740] sm:$0xff] }
  0x47   :  { %2413 = vmatpush1.bf16.msra.mxu0 %v2412_v30  ;;  %2719 = vmatprep.subr.bf16.mxu1 %v2718_v31  ;;  %v2736_v30 = vpack.c.bf16 %v60_v22, %v57_v21  ;;  %v253_v31 = vld [vmem:[%s5331_s1 + $0x720] sm:$0xff]  ;;  %v2434_v39 = vpack.c.bf16 %v257_v29, %v254_v28  ;;  %v2752_v21 = vpack.c.bf16 %v132_v14, %v129_v13  ;;  %v192_v29 = vld [vmem:[%s5331_s1 + $0x538] sm:$0xff] }
  0x48   :  { %2415 = vmatprep.subr.bf16.mxu0 %v2414_v37  ;;  %1330 = vmatprep.mubr.f32.mxu1 %v3405_v33  ;;  %v45_v33 = vld [vmem:[%s5331_s1 + $0xa0] sm:$0xff]  ;;  %v66_v37 = vld [vmem:[%s5331_s1 + $0x148] sm:$0xff]  ;;  %v2436_v49 = vpack.c.bf16 %v256_v40, %v253_v31  ;;  %v2448_v22 = vpack.c.bf16 %v274_v16, %v271_v12  ;;  %v287_v31 = vld [vmem:[%s5331_s1 + $0x830] sm:$0xff] }
  0x49   :  { %v2728_v4 = vpack.c.bf16 %v48_v60, %v45_v33  ;;  %v2740_v47 = vpack.c.bf16 %v66_v37, %v63_v36  ;;  %v2744_v33 = vpack.c.bf16 %v72_v53, %v69_v52  ;;  %v2440_v60 = vpack.c.bf16 %v262_v55, %v259_v51  ;;  %v189_v28 = vld [vmem:[%s5331_s1 + $0x520] sm:$0xff]  ;;  %v283_v37 = vld [vmem:[%s5331_s1 + $0x810] sm:$0xff]  ;;  %v144_v40 = vld [vmem:[%s5331_s1 + $0x3b8] sm:$0xff] }
  0x4a   :  { %2721 = vmatpush3.bf16.msra.mxu1 %v2720_v44  ;;  %v3675_v44 = vrot.slane %v3662_v38, %v3362_v11  ;;  %v2758_v36 = vpack.c.bf16 %v192_v29, %v189_v28  ;;  %v289_v53 = vld [vmem:[%s5331_s1 + $0x840] sm:$0xff]  ;;  %v150_v55 = vld [vmem:[%s5331_s1 + $0x3e8] sm:$0xff] }
  0x4b   :  { %2417 = vmatpush1.bf16.msra.mxu0 %v2416_v45  ;;  %2723 = vmatprep.subr.bf16.mxu1 %v2722_v46  ;;  %v260_v45 = vld [vmem:[%s5331_s1 + $0x758] sm:$0xff]  ;;  %v263_v46 = vld [vmem:[%s5331_s1 + $0x770] sm:$0xff]  ;;  %v301_v14 = vld [vmem:[%s5331_s1 + $0x8a0] sm:$0xff] }
  0x4c   :  { %2419 = vmatprep.subr.bf16.mxu0 %v2418_v50  ;;  %v3685_v48 = vcombine.high %v3675_v44, %v3675_v44  ;;  %v2742_v50 = vpack.c.bf16 %v120_v43, %v117_v42  ;;  %v2438_v54 = vpack.c.bf16 %v263_v46, %v260_v45  ;;  %v286_v43 = vld [vmem:[%s5331_s1 + $0x828] sm:$0xff]  ;;  %v195_v45 = vld [vmem:[%s5331_s1 + $0x550] sm:$0xff] }
  0x4d   :  { %v198_v46 = vld [vmem:[%s5331_s1 + $0x568] sm:$0xff]  ;;  %v2456_v51 = vpack.c.bf16 %v286_v43, %v283_v37  ;;  %v219_v43 = vld [vmem:[%s5331_s1 + $0x610] sm:$0xff] }
  0x4e   :  { %2725 = vmatpush3.bf16.msra.mxu1 %v2724_v56  ;;  %v171_v56 = vld [vmem:[%s5331_s1 + $0x490] sm:$0xff]  ;;  %975 = vmatprep.mubr.f32.mxu0 %v3685_v48  ;;  %v2762_v52 = vpack.c.bf16 %v198_v46, %v195_v45  ;;  %v162_v16 = vld [vmem:[%s5331_s1 + $0x448] sm:$0xff]  ;;  %v316_v46 = vld [vmem:[%s5331_s1 + $0x918] sm:$0xff] }
  0x4f   :  { %2421 = vmatpush1.bf16.msra.mxu0 %v2420_v57  ;;  %2727 = vmatprep.subr.bf16.mxu1 %v2726_v58  ;;  %v174_v57 = vld [vmem:[%s5331_s1 + $0x4a8] sm:$0xff] }
  0x50   :  { %2423 = vmatprep.subr.bf16.mxu0 %v2422_v62  ;;  %v266_v58 = vld [vmem:[%s5331_s1 + $0x788] sm:$0xff]  ;;  %v2746_v62 = vpack.c.bf16 %v174_v57, %v171_v56  ;;  %v292_v57 = vld [vmem:[%s5331_s1 + $0x858] sm:$0xff] }
  0x51   :  { %v2442_v2 = vpack.c.bf16 %v269_v59, %v266_v58  ;;  %v201_v58 = vld [vmem:[%s5331_s1 + $0x580] sm:$0xff]  ;;  %v204_v59 = vld [vmem:[%s5331_s1 + $0x598] sm:$0xff]  ;;  %v2460_v63 = vpack.c.bf16 %v292_v57, %v289_v53  ;;  %v310_v29 = vld [vmem:[%s5331_s1 + $0x8e8] sm:$0xff] }
  0x52   :  { %2729 = vmatpush3.bf16.msra.mxu1 %v2728_v4  ;;  %v177_v4 = vld [vmem:[%s5331_s1 + $0x4c0] sm:$0xff]  ;;  %v2766_v0 = vpack.c.bf16 %v204_v59, %v201_v58  ;;  %v222_v45 = vld [vmem:[%s5331_s1 + $0x628] sm:$0xff]  ;;  %v228_v58 = vld [vmem:[%s5331_s1 + $0x658] sm:$0xff] }
  0x53   :  { %2425 = vmatpush1.bf16.msra.mxu0 %v2424_v5  ;;  %2731 = vmatprep.subr.bf16.mxu1 %v2730_v6  ;;  %v180_v5 = vld [vmem:[%s5331_s1 + $0x4d8] sm:$0xff]  ;;  %v2780_v53 = vpack.c.bf16 %v222_v45, %v219_v43  ;;  %v225_v57 = vld [vmem:[%s5331_s1 + $0x640] sm:$0xff]  ;;  %v343_v43 = vld [vmem:[%s5331_s1 + $0x9f0] sm:$0xff] }
  0x54   :  { %2427 = vmatprep.subr.bf16.mxu0 %v2426_v10  ;;  %v272_v6 = vld [vmem:[%s5331_s1 + $0x7b8] sm:$0xff]  ;;  %v2750_v10 = vpack.c.bf16 %v180_v5, %v177_v4  ;;  %v298_v5 = vld [vmem:[%s5331_s1 + $0x888] sm:$0xff]  ;;  %v249_v45 = vld [vmem:[%s5331_s1 + $0x700] sm:$0xff] }
  0x55   :  { %v2446_v15 = vpack.c.bf16 %v275_v7, %v272_v6  ;;  %v207_v6 = vld [vmem:[%s5331_s1 + $0x5b0] sm:$0xff]  ;;  %v210_v7 = vld [vmem:[%s5331_s1 + $0x5c8] sm:$0xff]  ;;  %v2464_v12 = vpack.c.bf16 %v298_v5, %v295_v1 }
  0x56   :  { %2733 = vmatpush3.bf16.msra.mxu1 %v2732_v17  ;;  %v183_v17 = vld [vmem:[%s5331_s1 + $0x4f0] sm:$0xff]  ;;  %v2770_v13 = vpack.c.bf16 %v210_v7, %v207_v6  ;;  %v234_v6 = vld [vmem:[%s5331_s1 + $0x688] sm:$0xff] }
  0x57   :  { %2429 = vmatpush1.bf16.msra.mxu0 %v2428_v18  ;;  %2735 = vmatprep.subr.bf16.mxu1 %v2734_v19  ;;  %v186_v18 = vld [vmem:[%s5331_s1 + $0x508] sm:$0xff]  ;;  %v231_v5 = vld [vmem:[%s5331_s1 + $0x670] sm:$0xff] }
  0x58   :  { %2431 = vmatprep.subr.bf16.mxu0 %v2430_v23  ;;  %v278_v19 = vld [vmem:[%s5331_s1 + $0x7e8] sm:$0xff]  ;;  %v2754_v23 = vpack.c.bf16 %v186_v18, %v183_v17  ;;  %v304_v18 = vld [vmem:[%s5331_s1 + $0x8b8] sm:$0xff] }
  0x59   :  { %v2450_v27 = vpack.c.bf16 %v281_v20, %v278_v19  ;;  %v213_v19 = vld [vmem:[%s5331_s1 + $0x5e0] sm:$0xff]  ;;  %v216_v20 = vld [vmem:[%s5331_s1 + $0x5f8] sm:$0xff] }
  0x5a   :  { %2737 = vmatpush3.bf16.msra.mxu1 %v2736_v30  ;;  %v284_v30 = vld [vmem:[%s5331_s1 + $0x818] sm:$0xff] }
  0x5b   :  { %2433 = vmatpush1.bf16.msra.mxu0 %v2432_v32  ;;  %2739 = vmatprep.subr.bf16.mxu1 %v2738_v35  ;;  %v2756_v32 = vpack.c.bf16 %v138_v26, %v135_v24  ;;  %v2454_v42 = vpack.c.bf16 %v287_v31, %v284_v30  ;;  %v2774_v24 = vpack.c.bf16 %v216_v20, %v213_v19  ;;  %v307_v26 = vld [vmem:[%s5331_s1 + $0x8d0] sm:$0xff]  ;;  %v270_v31 = vld [vmem:[%s5331_s1 + $0x7a8] sm:$0xff] }
  0x5c   :  { %2435 = vmatprep.subr.bf16.mxu0 %v2434_v39  ;;  %v141_v39 = vld [vmem:[%s5331_s1 + $0x3a0] sm:$0xff]  ;;  %v267_v30 = vld [vmem:[%s5331_s1 + $0x790] sm:$0xff]  ;;  %v334_v20 = vld [vmem:[%s5331_s1 + $0x9a8] sm:$0xff] }
  0x5e   :  { %2741 = vmatpush3.bf16.msra.mxu1 %v2740_v47  ;;  %v290_v47 = vld [vmem:[%s5331_s1 + $0x848] sm:$0xff] }
  0x5f   :  { %2437 = vmatpush1.bf16.msra.mxu0 %v2436_v49  ;;  %2743 = vmatprep.subr.bf16.mxu1 %v2742_v50  ;;  %v293_v49 = vld [vmem:[%s5331_s1 + $0x860] sm:$0xff]  ;;  %v2760_v50 = vpack.c.bf16 %v144_v40, %v141_v39  ;;  %v2472_v39 = vpack.c.bf16 %v310_v29, %v307_v26  ;;  %v2778_v40 = vpack.c.bf16 %v270_v31, %v267_v30  ;;  %v246_v29 = vld [vmem:[%s5331_s1 + $0x6e8] sm:$0xff]  ;;  %v340_v31 = vld [vmem:[%s5331_s1 + $0x9d8] sm:$0xff] }
  0x60   :  { %2439 = vmatprep.subr.bf16.mxu0 %v2438_v54  ;;  %v147_v54 = vld [vmem:[%s5331_s1 + $0x3d0] sm:$0xff]  ;;  %v2458_v56 = vpack.c.bf16 %v293_v49, %v290_v47  ;;  %v273_v47 = vld [vmem:[%s5331_s1 + $0x7c0] sm:$0xff]  ;;  %v276_v49 = vld [vmem:[%s5331_s1 + $0x7d8] sm:$0xff] }
  0x62   :  { %2745 = vmatpush3.bf16.msra.mxu1 %v2744_v33  ;;  %v296_v33 = vld [vmem:[%s5331_s1 + $0x878] sm:$0xff] }
  0x63   :  { %2441 = vmatpush1.bf16.msra.mxu0 %v2440_v60  ;;  %2747 = vmatprep.subr.bf16.mxu1 %v2746_v62  ;;  %v299_v60 = vld [vmem:[%s5331_s1 + $0x890] sm:$0xff]  ;;  %v2764_v62 = vpack.c.bf16 %v150_v55, %v147_v54  ;;  %v2782_v55 = vpack.c.bf16 %v276_v49, %v273_v47  ;;  %v346_v47 = vld [vmem:[%s5331_s1 + $0xa08] sm:$0xff] }
  0x64   :  { %2443 = vmatprep.subr.bf16.mxu0 %v2442_v2  ;;  %v153_v2 = vld [vmem:[%s5331_s1 + $0x400] sm:$0xff]  ;;  %v2462_v4 = vpack.c.bf16 %v299_v60, %v296_v33  ;;  %v322_v33 = vld [vmem:[%s5331_s1 + $0x948] sm:$0xff]  ;;  %v279_v60 = vld [vmem:[%s5331_s1 + $0x7f0] sm:$0xff] }
  0x65   :  { %1331 = vmatmul.mubr.f32.vlgmr.msra.gmra.mrb[2].mxu1 %v3392_v25  ;;  %v277_v25 = vld [vmem:[%s5331_s1 + $0x7e0] sm:$0xff]  ;;  %v303_v49 = vld [vmem:[%s5331_s1 + $0x8b0] sm:$0xff] }
  0x66   :  { %2749 = vmatpush3.bf16.msra.mxu1 %v2748_v8  ;;  %1400 = vmatprep.mubr.f32.mxu1 %v3428_v41  ;;  %v280_v41 = vld [vmem:[%s5331_s1 + $0x7f8] sm:$0xff]  ;;  %v302_v8 = vld [vmem:[%s5331_s1 + $0x8a8] sm:$0xff] }
  0x67   :  { %2445 = vmatpush1.bf16.msra.mxu0 %v2444_v9  ;;  %2751 = vmatprep.subr.bf16.mxu1 %v2750_v10  ;;  %v2452_v35 = vpack.c.bf16 %v280_v41, %v277_v25  ;;  %v305_v9 = vld [vmem:[%s5331_s1 + $0x8c0] sm:$0xff]  ;;  %v2768_v10 = vpack.c.bf16 %v156_v3, %v153_v2  ;;  %v2468_v25 = vpack.c.bf16 %v304_v18, %v301_v14  ;;  %v168_v41 = vld [vmem:[%s5331_s1 + $0x478] sm:$0xff] }
  0x68   :  { %2447 = vmatprep.subr.bf16.mxu0 %v2446_v15  ;;  %v159_v15 = vld [vmem:[%s5331_s1 + $0x430] sm:$0xff]  ;;  %v2466_v17 = vpack.c.bf16 %v305_v9, %v302_v8  ;;  %v2784_v2 = vpack.c.bf16 %v228_v58, %v225_v57  ;;  %v328_v8 = vld [vmem:[%s5331_s1 + $0x978] sm:$0xff]  ;;  %v285_v9 = vld [vmem:[%s5331_s1 + $0x820] sm:$0xff]  ;;  %v2788_v14 = vpack.c.bf16 %v234_v6, %v231_v5 }
  0x69   :  { %v240_v18 = vld [vmem:[%s5331_s1 + $0x6b8] sm:$0xff]  ;;  %v349_v57 = vld [vmem:[%s5331_s1 + $0xa20] sm:$0xff]  ;;  %v255_v58 = vld [vmem:[%s5331_s1 + $0x730] sm:$0xff] }
  0x6a   :  { %2753 = vmatpush3.bf16.msra.mxu1 %v2752_v21  ;;  %v308_v21 = vld [vmem:[%s5331_s1 + $0x8d8] sm:$0xff]  ;;  %v355_v5 = vld [vmem:[%s5331_s1 + $0xa50] sm:$0xff]  ;;  %v261_v6 = vld [vmem:[%s5331_s1 + $0x760] sm:$0xff] }
  0x6b   :  { %2449 = vmatpush1.bf16.msra.mxu0 %v2448_v22  ;;  %2755 = vmatprep.subr.bf16.mxu1 %v2754_v23  ;;  %v311_v22 = vld [vmem:[%s5331_s1 + $0x8f0] sm:$0xff]  ;;  %v2772_v23 = vpack.c.bf16 %v162_v16, %v159_v15 }
  0x6c   :  { %2451 = vmatprep.subr.bf16.mxu0 %v2450_v27  ;;  %v165_v27 = vld [vmem:[%s5331_s1 + $0x460] sm:$0xff]  ;;  %v2470_v28 = vpack.c.bf16 %v311_v22, %v308_v21  ;;  %v291_v21 = vld [vmem:[%s5331_s1 + $0x850] sm:$0xff]  ;;  %v294_v22 = vld [vmem:[%s5331_s1 + $0x868] sm:$0xff] }
  0x6d   :  { %v2776_v37 = vpack.c.bf16 %v168_v41, %v165_v27  ;;  %v2794_v27 = vpack.c.bf16 %v294_v22, %v291_v21  ;;  %v337_v41 = vld [vmem:[%s5331_s1 + $0x9c0] sm:$0xff]  ;;  %v364_v21 = vld [vmem:[%s5331_s1 + $0xa98] sm:$0xff] }
  0x6e   :  { %2757 = vmatpush3.bf16.msra.mxu1 %v2756_v32  ;;  %v314_v32 = vld [vmem:[%s5331_s1 + $0x908] sm:$0xff]  ;;  %v369_v22 = vld [vmem:[%s5331_s1 + $0xac0] sm:$0xff] }
  0x6f   :  { %2453 = vmatpush1.bf16.msra.mxu0 %v2452_v35  ;;  %2759 = vmatprep.subr.bf16.mxu1 %v2758_v36  ;;  %v317_v35 = vld [vmem:[%s5331_s1 + $0x920] sm:$0xff]  ;;  %v711_v36 = vcombine.high %v3662_v38, %v3662_v38 }
  0x70   :  { %2455 = vmatprep.subr.bf16.mxu0 %v2454_v42  ;;  %v313_v42 = vld [vmem:[%s5331_s1 + $0x900] sm:$0xff]  ;;  %v2474_v38 = vpack.c.bf16 %v317_v35, %v314_v32  ;;  %v300_v35 = vld [vmem:[%s5331_s1 + $0x898] sm:$0xff] }
  0x71   :  { %v2476_v54 = vpack.c.bf16 %v316_v46, %v313_v42  ;;  %v297_v32 = vld [vmem:[%s5331_s1 + $0x880] sm:$0xff] }
  0x72   :  { %2761 = vmatpush3.bf16.msra.mxu1 %v2760_v50  ;;  %v320_v50 = vld [vmem:[%s5331_s1 + $0x938] sm:$0xff]  ;;  %v2798_v42 = vpack.c.bf16 %v300_v35, %v297_v32  ;;  %v370_v32 = vld [vmem:[%s5331_s1 + $0xac8] sm:$0xff]  ;;  %v375_v35 = vld [vmem:[%s5331_s1 + $0xaf0] sm:$0xff] }
  0x73   :  { %2457 = vmatpush1.bf16.msra.mxu0 %v2456_v51  ;;  %2763 = vmatprep.subr.bf16.mxu1 %v2762_v52  ;;  %v323_v51 = vld [vmem:[%s5331_s1 + $0x950] sm:$0xff]  ;;  %v3933_v52 = vrot.slane %v711_v36, %v3362_v11  ;;  %v344_v36 = vld [vmem:[%s5331_s1 + $0x9f8] sm:$0xff] }
  0x74   :  { %2459 = vmatprep.subr.bf16.mxu0 %v2458_v56  ;;  %v319_v56 = vld [vmem:[%s5331_s1 + $0x930] sm:$0xff]  ;;  %v2478_v59 = vpack.c.bf16 %v323_v51, %v320_v50  ;;  %v306_v50 = vld [vmem:[%s5331_s1 + $0x8c8] sm:$0xff] }
  0x75   :  { %v3962_v1 = vcombine.high %v3933_v52, %v3933_v52  ;;  %v2480_v3 = vpack.c.bf16 %v322_v33, %v319_v56  ;;  %v350_v51 = vld [vmem:[%s5331_s1 + $0xa28] sm:$0xff]  ;;  %v2802_v56 = vpack.c.bf16 %v306_v50, %v303_v49  ;;  %v384_v49 = vld [vmem:[%s5331_s1 + $0xb38] sm:$0xff] }
  0x76   :  { %2765 = vmatpush3.bf16.msra.mxu1 %v2764_v62  ;;  %v282_v62 = vld [vmem:[%s5331_s1 + $0x808] sm:$0xff]  ;;  %v380_v50 = vld [vmem:[%s5331_s1 + $0xb18] sm:$0xff] }
  0x77   :  { %2461 = vmatpush1.bf16.msra.mxu0 %v2460_v63  ;;  %2767 = vmatprep.subr.bf16.mxu1 %v2766_v0  ;;  %v326_v63 = vld [vmem:[%s5331_s1 + $0x968] sm:$0xff]  ;;  %v329_v0 = vld [vmem:[%s5331_s1 + $0x980] sm:$0xff] }
  0x78   :  { %2463 = vmatprep.subr.bf16.mxu0 %v2462_v4  ;;  %v325_v4 = vld [vmem:[%s5331_s1 + $0x960] sm:$0xff]  ;;  %v2482_v7 = vpack.c.bf16 %v329_v0, %v326_v63  ;;  %v312_v63 = vld [vmem:[%s5331_s1 + $0x8f8] sm:$0xff] }
  0x79   :  { %v2484_v15 = vpack.c.bf16 %v328_v8, %v325_v4  ;;  %v356_v0 = vld [vmem:[%s5331_s1 + $0xa58] sm:$0xff] }
  0x7a   :  { %2769 = vmatpush3.bf16.msra.mxu1 %v2768_v10  ;;  %v288_v10 = vld [vmem:[%s5331_s1 + $0x838] sm:$0xff] }
  0x7b   :  { %2465 = vmatpush1.bf16.msra.mxu0 %v2464_v12  ;;  %2771 = vmatprep.subr.bf16.mxu1 %v2770_v13  ;;  %v332_v12 = vld [vmem:[%s5331_s1 + $0x998] sm:$0xff]  ;;  %v335_v13 = vld [vmem:[%s5331_s1 + $0x9b0] sm:$0xff]  ;;  %v2790_v16 = vpack.c.bf16 %v288_v10, %v285_v9  ;;  %v358_v9 = vld [vmem:[%s5331_s1 + $0xa68] sm:$0xff] }
  0x7c   :  { %2467 = vmatprep.subr.bf16.mxu0 %v2466_v17  ;;  %v237_v17 = vld [vmem:[%s5331_s1 + $0x6a0] sm:$0xff]  ;;  %v2486_v19 = vpack.c.bf16 %v335_v13, %v332_v12  ;;  %v363_v10 = vld [vmem:[%s5331_s1 + $0xa90] sm:$0xff]  ;;  %v366_v12 = vld [vmem:[%s5331_s1 + $0xaa8] sm:$0xff] }
  0x7d   :  { %v362_v13 = vld [vmem:[%s5331_s1 + $0xa88] sm:$0xff] }
  0x7e   :  { %2773 = vmatpush3.bf16.msra.mxu1 %v2772_v23  ;;  %v338_v23 = vld [vmem:[%s5331_s1 + $0x9c8] sm:$0xff] }
  0x7f   :  { %2469 = vmatpush1.bf16.msra.mxu0 %v2468_v25  ;;  %2775 = vmatprep.subr.bf16.mxu1 %v2774_v24  ;;  %v341_v25 = vld [vmem:[%s5331_s1 + $0x9e0] sm:$0xff]  ;;  %v2792_v24 = vpack.c.bf16 %v240_v18, %v237_v17  ;;  %v315_v18 = vld [vmem:[%s5331_s1 + $0x910] sm:$0xff] }
  0x80   :  { %2471 = vmatprep.subr.bf16.mxu0 %v2470_v28  ;;  %v243_v28 = vld [vmem:[%s5331_s1 + $0x6d0] sm:$0xff]  ;;  %v2490_v30 = vpack.c.bf16 %v341_v25, %v338_v23  ;;  %v361_v17 = vld [vmem:[%s5331_s1 + $0xa80] sm:$0xff]  ;;  %v372_v23 = vld [vmem:[%s5331_s1 + $0xad8] sm:$0xff] }
  0x81   :  { %v368_v25 = vld [vmem:[%s5331_s1 + $0xab8] sm:$0xff] }
  0x82   :  { %2777 = vmatpush3.bf16.msra.mxu1 %v2776_v37  ;;  %v347_v37 = vld [vmem:[%s5331_s1 + $0xa10] sm:$0xff] }
  0x83   :  { %2473 = vmatpush1.bf16.msra.mxu0 %v2472_v39  ;;  %2779 = vmatprep.subr.bf16.mxu1 %v2778_v40  ;;  %v2796_v39 = vpack.c.bf16 %v246_v29, %v243_v28  ;;  %v2492_v40 = vpack.c.bf16 %v340_v31, %v337_v41  ;;  %v2494_v46 = vpack.c.bf16 %v347_v37, %v344_v36  ;;  %v367_v28 = vld [vmem:[%s5331_s1 + $0xab0] sm:$0xff]  ;;  %v321_v29 = vld [vmem:[%s5331_s1 + $0x940] sm:$0xff]  ;;  %v378_v36 = vld [vmem:[%s5331_s1 + $0xb08] sm:$0xff] }
  0x84   :  { %2475 = vmatprep.subr.bf16.mxu0 %v2474_v38  ;;  %v252_v38 = vld [vmem:[%s5331_s1 + $0x718] sm:$0xff]  ;;  %v2814_v41 = vpack.c.bf16 %v372_v23, %v369_v22  ;;  %v374_v37 = vld [vmem:[%s5331_s1 + $0xae8] sm:$0xff] }
  0x85   :  { %1401 = vmatmul.mubr.f32.vlgmr.msra.gmra.mrb[4].mxu1 %v3408_v34  ;;  %v2786_v34 = vpack.c.bf16 %v282_v62, %v279_v60  ;;  %v352_v60 = vld [vmem:[%s5331_s1 + $0xa38] sm:$0xff]  ;;  %v309_v62 = vld [vmem:[%s5331_s1 + $0x8e0] sm:$0xff]  ;;  %v402_v22 = vld [vmem:[%s5331_s1 + $0xbc8] sm:$0xff] }
  0x86   :  { %976 = vmatmul.mubr.f32.vlgmr.msra.gmra.mrb[0].mxu0 %v3675_v44  ;;  %2781 = vmatpush3.bf16.msra.mxu1 %v2780_v53  ;;  %v353_v53 = vld [vmem:[%s5331_s1 + $0xa40] sm:$0xff]  ;;  %v2806_v4 = vpack.c.bf16 %v312_v63, %v309_v62  ;;  %v390_v62 = vld [vmem:[%s5331_s1 + $0xb68] sm:$0xff] }
  0x87   :  { %2477 = vmatpush1.bf16.msra.mxu0 %v2476_v54  ;;  %2783 = vmatprep.subr.bf16.mxu1 %v2782_v55  ;;  %v2800_v54 = vpack.c.bf16 %v252_v38, %v249_v45  ;;  %v2496_v55 = vpack.c.bf16 %v346_v47, %v343_v43  ;;  %v2498_v33 = vpack.c.bf16 %v353_v53, %v350_v51  ;;  %v327_v45 = vld [vmem:[%s5331_s1 + $0x970] sm:$0xff]  ;;  %v330_v38 = vld [vmem:[%s5331_s1 + $0x988] sm:$0xff]  ;;  %v381_v47 = vld [vmem:[%s5331_s1 + $0xb20] sm:$0xff] }
  0x88   :  { %2479 = vmatprep.subr.bf16.mxu0 %v2478_v59  ;;  %1470 = vmatprep.mubr.f32.mxu1 %v3685_v48  ;;  %v331_v48 = vld [vmem:[%s5331_s1 + $0x990] sm:$0xff]  ;;  %v258_v59 = vld [vmem:[%s5331_s1 + $0x748] sm:$0xff]  ;;  %v2818_v43 = vpack.c.bf16 %v378_v36, %v375_v35  ;;  %v2820_v53 = vpack.c.bf16 %v330_v38, %v327_v45  ;;  %v408_v35 = vld [vmem:[%s5331_s1 + $0xbf8] sm:$0xff] }
  0x89   :  { %1046 = vmatprep.mubr.f32.mxu0 %v3962_v1  ;;  %v2488_v26 = vpack.c.bf16 %v334_v20, %v331_v48  ;;  %v2810_v48 = vpack.c.bf16 %v366_v12, %v363_v10  ;;  %v383_v51 = vld [vmem:[%s5331_s1 + $0xb30] sm:$0xff]  ;;  %v386_v63 = vld [vmem:[%s5331_s1 + $0xb48] sm:$0xff]  ;;  %v396_v10 = vld [vmem:[%s5331_s1 + $0xb98] sm:$0xff] }
  0x8a   :  { %2785 = vmatpush3.bf16.msra.mxu1 %v2784_v2  ;;  %v359_v2 = vld [vmem:[%s5331_s1 + $0xa70] sm:$0xff]  ;;  %v392_v12 = vld [vmem:[%s5331_s1 + $0xb78] sm:$0xff]  ;;  %v398_v23 = vld [vmem:[%s5331_s1 + $0xba8] sm:$0xff] }
  0x8b   :  { %2481 = vmatpush1.bf16.msra.mxu0 %v2480_v3  ;;  %2787 = vmatprep.subr.bf16.mxu1 %v2786_v34  ;;  %v2804_v3 = vpack.c.bf16 %v258_v59, %v255_v58  ;;  %v2500_v34 = vpack.c.bf16 %v352_v60, %v349_v57  ;;  %v2502_v8 = vpack.c.bf16 %v359_v2, %v356_v0  ;;  %v333_v57 = vld [vmem:[%s5331_s1 + $0x9a0] sm:$0xff]  ;;  %v336_v58 = vld [vmem:[%s5331_s1 + $0x9b8] sm:$0xff]  ;;  %v387_v60 = vld [vmem:[%s5331_s1 + $0xb50] sm:$0xff] }
  0x8c   :  { %2483 = vmatprep.subr.bf16.mxu0 %v2482_v7  ;;  %v264_v7 = vld [vmem:[%s5331_s1 + $0x778] sm:$0xff]  ;;  %v2518_v59 = vpack.c.bf16 %v383_v51, %v380_v50  ;;  %v389_v0 = vld [vmem:[%s5331_s1 + $0xb60] sm:$0xff]  ;;  %v2824_v2 = vpack.c.bf16 %v336_v58, %v333_v57  ;;  %v4308_v51 = vld [vmem:[%s5330_s0 + $0x10] sm:$0xff] }
  0x8d   :  { %v404_v36 = vld [vmem:[%s5331_s1 + $0xbd8] sm:$0xff]  ;;  %v413_v50 = vld [vmem:[%s5331_s1 + $0xc20] sm:$0xff]  ;;  %v411_v57 = vld [vmem:[%s5331_s1 + $0xc10] sm:$0xff] }
  0x8e   :  { %2789 = vmatpush3.bf16.msra.mxu1 %v2788_v14  ;;  %v365_v14 = vld [vmem:[%s5331_s1 + $0xaa0] sm:$0xff]  ;;  %v360_v45 = vld [vmem:[%s5331_s1 + $0xa78] sm:$0xff]  ;;  %v414_v58 = vld [vmem:[%s5331_s1 + $0xc28] sm:$0xff] }
  0x8f   :  { %2485 = vmatpush1.bf16.msra.mxu0 %v2484_v15  ;;  %2791 = vmatprep.subr.bf16.mxu1 %v2790_v16  ;;  %v2808_v15 = vpack.c.bf16 %v264_v7, %v261_v6  ;;  %v2504_v16 = vpack.c.bf16 %v358_v9, %v355_v5  ;;  %v2506_v20 = vpack.c.bf16 %v365_v14, %v362_v13  ;;  %v339_v5 = vld [vmem:[%s5331_s1 + $0x9d0] sm:$0xff]  ;;  %v342_v6 = vld [vmem:[%s5331_s1 + $0x9e8] sm:$0xff]  ;;  %v393_v9 = vld [vmem:[%s5331_s1 + $0xb80] sm:$0xff] }
  0x90   :  { %2487 = vmatprep.subr.bf16.mxu0 %v2486_v19  ;;  %v318_v19 = vld [vmem:[%s5331_s1 + $0x928] sm:$0xff]  ;;  %v2522_v7 = vpack.c.bf16 %v389_v0, %v386_v63  ;;  %v395_v13 = vld [vmem:[%s5331_s1 + $0xb90] sm:$0xff]  ;;  %v2828_v14 = vpack.c.bf16 %v342_v6, %v339_v5  ;;  %v4330_v63 = vrot.slane %v4308_v51, %v3362_v11  ;;  %v416_v0 = vld [vmem:[%s5331_s1 + $0xc38] sm:$0xff] }
  0x91   :  { %v415_v5 = vld [vmem:[%s5331_s1 + $0xc30] sm:$0xff]  ;;  %v417_v6 = vld [vmem:[%s5331_s1 + $0xc40] sm:$0xff] }
  0x92   :  { %2793 = vmatpush3.bf16.msra.mxu1 %v2792_v24  ;;  %v371_v24 = vld [vmem:[%s5331_s1 + $0xad0] sm:$0xff] }
  0x93   :  { %2489 = vmatpush1.bf16.msra.mxu0 %v2488_v26  ;;  %2795 = vmatprep.subr.bf16.mxu1 %v2794_v27  ;;  %v2812_v26 = vpack.c.bf16 %v318_v19, %v315_v18  ;;  %v2508_v27 = vpack.c.bf16 %v364_v21, %v361_v17  ;;  %v2510_v31 = vpack.c.bf16 %v371_v24, %v368_v25  ;;  %v345_v17 = vld [vmem:[%s5331_s1 + $0xa00] sm:$0xff]  ;;  %v348_v18 = vld [vmem:[%s5331_s1 + $0xa18] sm:$0xff]  ;;  %v399_v21 = vld [vmem:[%s5331_s1 + $0xbb0] sm:$0xff] }
  0x94   :  { %2491 = vmatprep.subr.bf16.mxu0 %v2490_v30  ;;  %v324_v30 = vld [vmem:[%s5331_s1 + $0x958] sm:$0xff]  ;;  %v2526_v19 = vpack.c.bf16 %v395_v13, %v392_v12  ;;  %v401_v25 = vld [vmem:[%s5331_s1 + $0xbc0] sm:$0xff]  ;;  %v2832_v24 = vpack.c.bf16 %v348_v18, %v345_v17  ;;  %v474_v12 = vld [vmem:[%s5331_s1 + $0xe08] sm:$0xff]  ;;  %v743_v13 = vcombine.high %v4330_v63, %v4330_v63 }
  0x95   :  { %v421_v18 = vld [vmem:[%s5331_s1 + $0xc60] sm:$0xff] }
  0x96   :  { %2797 = vmatpush3.bf16.msra.mxu1 %v2796_v39  ;;  %v377_v39 = vld [vmem:[%s5331_s1 + $0xb00] sm:$0xff] }
  0x97   :  { %2493 = vmatpush1.bf16.msra.mxu0 %v2492_v40  ;;  %2799 = vmatprep.subr.bf16.mxu1 %v2798_v42  ;;  %v2816_v40 = vpack.c.bf16 %v324_v30, %v321_v29  ;;  %v2512_v42 = vpack.c.bf16 %v370_v32, %v367_v28  ;;  %v351_v28 = vld [vmem:[%s5331_s1 + $0xa30] sm:$0xff]  ;;  %v354_v29 = vld [vmem:[%s5331_s1 + $0xa48] sm:$0xff]  ;;  %v2530_v30 = vpack.c.bf16 %v401_v25, %v398_v23  ;;  %v405_v32 = vld [vmem:[%s5331_s1 + $0xbe0] sm:$0xff] }
  0x98   :  { %2495 = vmatprep.subr.bf16.mxu0 %v2494_v46  ;;  %v2514_v46 = vpack.c.bf16 %v377_v39, %v374_v37  ;;  %v407_v37 = vld [vmem:[%s5331_s1 + $0xbf0] sm:$0xff]  ;;  %v2836_v39 = vpack.c.bf16 %v354_v29, %v351_v28  ;;  %v480_v23 = vld [vmem:[%s5331_s1 + $0xe38] sm:$0xff]  ;;  %v429_v29 = vld [vmem:[%s5331_s1 + $0xca0] sm:$0xff] }
  0x99   :  { %v2534_v38 = vpack.c.bf16 %v407_v37, %v404_v36  ;;  %v428_v25 = vld [vmem:[%s5331_s1 + $0xc98] sm:$0xff]  ;;  %v427_v28 = vld [vmem:[%s5331_s1 + $0xc90] sm:$0xff]  ;;  %v486_v36 = vld [vmem:[%s5331_s1 + $0xe68] sm:$0xff] }
  0x9a   :  { %2801 = vmatpush3.bf16.msra.mxu1 %v2800_v54  ;;  %v434_v37 = vld [vmem:[%s5331_s1 + $0xcc8] sm:$0xff] }
  0x9b   :  { %2497 = vmatpush1.bf16.msra.mxu0 %v2496_v55  ;;  %2803 = vmatprep.subr.bf16.mxu1 %v2802_v56  ;;  %v2822_v55 = vpack.c.bf16 %v384_v49, %v381_v47  ;;  %v379_v56 = vld [vmem:[%s5331_s1 + $0xb10] sm:$0xff]  ;;  %v462_v47 = vld [vmem:[%s5331_s1 + $0xda8] sm:$0xff] }
  0x9c   :  { %2499 = vmatprep.subr.bf16.mxu0 %v2498_v33  ;;  %v382_v33 = vld [vmem:[%s5331_s1 + $0xb28] sm:$0xff] }
  0x9d   :  { %v410_v49 = vld [vmem:[%s5331_s1 + $0xc08] sm:$0xff] }
  0x9e   :  { %2805 = vmatpush3.bf16.msra.mxu1 %v2804_v3  ;;  %v2520_v3 = vpack.c.bf16 %v382_v33, %v379_v56  ;;  %v409_v56 = vld [vmem:[%s5331_s1 + $0xc00] sm:$0xff]  ;;  %v412_v33 = vld [vmem:[%s5331_s1 + $0xc18] sm:$0xff] }
  0x9f   :  { %2501 = vmatpush1.bf16.msra.mxu0 %v2500_v34  ;;  %2807 = vmatprep.subr.bf16.mxu1 %v2806_v4  ;;  %v2826_v34 = vpack.c.bf16 %v390_v62, %v387_v60  ;;  %v385_v4 = vld [vmem:[%s5331_s1 + $0xb40] sm:$0xff]  ;;  %v468_v62 = vld [vmem:[%s5331_s1 + $0xdd8] sm:$0xff] }
  0xa0   :  { %2503 = vmatprep.subr.bf16.mxu0 %v2502_v8  ;;  %v388_v8 = vld [vmem:[%s5331_s1 + $0xb58] sm:$0xff]  ;;  %v465_v60 = vld [vmem:[%s5331_s1 + $0xdc0] sm:$0xff] }
  0xa2   :  { %2809 = vmatpush3.bf16.msra.mxu1 %v2808_v15  ;;  %v2524_v15 = vpack.c.bf16 %v388_v8, %v385_v4  ;;  %v2846_v4 = vpack.c.bf16 %v468_v62, %v465_v60 }
  0xa3   :  { %2505 = vmatpush1.bf16.msra.mxu0 %v2504_v16  ;;  %2811 = vmatprep.subr.bf16.mxu1 %v2810_v48  ;;  %v2830_v16 = vpack.c.bf16 %v396_v10, %v393_v9  ;;  %v391_v48 = vld [vmem:[%s5331_s1 + $0xb70] sm:$0xff]  ;;  %v418_v9 = vld [vmem:[%s5331_s1 + $0xc48] sm:$0xff] }
  0xa4   :  { %2507 = vmatprep.subr.bf16.mxu0 %v2506_v20  ;;  %v394_v20 = vld [vmem:[%s5331_s1 + $0xb88] sm:$0xff]  ;;  %v471_v10 = vld [vmem:[%s5331_s1 + $0xdf0] sm:$0xff] }
  0xa5   :  { %1471 = vmatmul.mubr.f32.vlgmr.msra.gmra.mrb[6].mxu1 %v3675_v44  ;;  %v373_v44 = vld [vmem:[%s5331_s1 + $0xae0] sm:$0xff]  ;;  %v2850_v17 = vpack.c.bf16 %v474_v12, %v471_v10 }
  0xa6   :  { %2813 = vmatpush3.bf16.msra.mxu1 %v2812_v26  ;;  %1540 = vmatprep.mubr.f32.mxu1 %v3962_v1  ;;  %v376_v1 = vld [vmem:[%s5331_s1 + $0xaf8] sm:$0xff]  ;;  %v2528_v26 = vpack.c.bf16 %v394_v20, %v391_v48  ;;  %v2544_v48 = vpack.c.bf16 %v418_v9, %v415_v5  ;;  %v426_v20 = vld [vmem:[%s5331_s1 + $0xc88] sm:$0xff] }
  0xa7   :  { %2509 = vmatpush1.bf16.msra.mxu0 %v2508_v27  ;;  %2815 = vmatprep.subr.bf16.mxu1 %v2814_v41  ;;  %v2516_v54 = vpack.c.bf16 %v376_v1, %v373_v44  ;;  %v2834_v27 = vpack.c.bf16 %v402_v22, %v399_v21  ;;  %v397_v41 = vld [vmem:[%s5331_s1 + $0xba0] sm:$0xff]  ;;  %v459_v1 = vld [vmem:[%s5331_s1 + $0xd90] sm:$0xff]  ;;  %v424_v21 = vld [vmem:[%s5331_s1 + $0xc78] sm:$0xff] }
  0xa8   :  { %2511 = vmatprep.subr.bf16.mxu0 %v2510_v31  ;;  %v400_v31 = vld [vmem:[%s5331_s1 + $0xbb8] sm:$0xff]  ;;  %v357_v44 = vld [vmem:[%s5331_s1 + $0xa60] sm:$0xff] }
  0xa9   :  { %v477_v22 = vld [vmem:[%s5331_s1 + $0xe20] sm:$0xff] }
  0xaa   :  { %2817 = vmatpush3.bf16.msra.mxu1 %v2816_v40  ;;  %v2532_v40 = vpack.c.bf16 %v400_v31, %v397_v41  ;;  %v2854_v41 = vpack.c.bf16 %v480_v23, %v477_v22 }
  0xab   :  { %2513 = vmatpush1.bf16.msra.mxu0 %v2512_v42  ;;  %2819 = vmatprep.subr.bf16.mxu1 %v2818_v43  ;;  %v2838_v42 = vpack.c.bf16 %v408_v35, %v405_v32  ;;  %v403_v43 = vld [vmem:[%s5331_s1 + $0xbd0] sm:$0xff]  ;;  %v430_v32 = vld [vmem:[%s5331_s1 + $0xca8] sm:$0xff] }
  0xac   :  { %2515 = vmatprep.subr.bf16.mxu0 %v2514_v46  ;;  %v406_v46 = vld [vmem:[%s5331_s1 + $0xbe8] sm:$0xff]  ;;  %v483_v35 = vld [vmem:[%s5331_s1 + $0xe50] sm:$0xff] }
  0xae   :  { %2821 = vmatpush3.bf16.msra.mxu1 %v2820_v53  ;;  %v2840_v53 = vpack.c.bf16 %v360_v45, %v357_v44  ;;  %v2858_v44 = vpack.c.bf16 %v486_v36, %v483_v35  ;;  %v436_v45 = vld [vmem:[%s5331_s1 + $0xcd8] sm:$0xff] }
  0xaf   :  { %2517 = vmatpush1.bf16.msra.mxu0 %v2516_v54  ;;  %2823 = vmatprep.subr.bf16.mxu1 %v2822_v55  ;;  %v2536_v54 = vpack.c.bf16 %v406_v46, %v403_v43  ;;  %v2842_v55 = vpack.c.bf16 %v462_v47, %v459_v1  ;;  %v2552_v43 = vpack.c.bf16 %v430_v32, %v427_v28  ;;  %v438_v46 = vld [vmem:[%s5331_s1 + $0xce8] sm:$0xff]  ;;  %v489_v47 = vld [vmem:[%s5331_s1 + $0xe80] sm:$0xff] }
  0xb0   :  { %2519 = vmatprep.subr.bf16.mxu0 %v2518_v59  ;;  %v2538_v59 = vpack.c.bf16 %v413_v50, %v410_v49  ;;  %v492_v49 = vld [vmem:[%s5331_s1 + $0xe98] sm:$0xff] }
  0xb2   :  { %2825 = vmatpush3.bf16.msra.mxu1 %v2824_v2  ;;  %v419_v2 = vld [vmem:[%s5331_s1 + $0xc50] sm:$0xff] }
  0xb3   :  { %2521 = vmatpush1.bf16.msra.mxu0 %v2520_v3  ;;  %2827 = vmatprep.subr.bf16.mxu1 %v2826_v34  ;;  %v2844_v3 = vpack.c.bf16 %v414_v58, %v411_v57  ;;  %v2540_v34 = vpack.c.bf16 %v412_v33, %v409_v56  ;;  %v2542_v8 = vpack.c.bf16 %v419_v2, %v416_v0 }
  0xb4   :  { %2523 = vmatprep.subr.bf16.mxu0 %v2522_v7  ;;  %v420_v7 = vld [vmem:[%s5331_s1 + $0xc58] sm:$0xff] }
  0xb6   :  { %2829 = vmatpush3.bf16.msra.mxu1 %v2828_v14  ;;  %v422_v14 = vld [vmem:[%s5331_s1 + $0xc68] sm:$0xff] }
  0xb7   :  { %2525 = vmatpush1.bf16.msra.mxu0 %v2524_v15  ;;  %2831 = vmatprep.subr.bf16.mxu1 %v2830_v16  ;;  %v425_v15 = vld [vmem:[%s5331_s1 + $0xc80] sm:$0xff]  ;;  %v2848_v16 = vpack.c.bf16 %v420_v7, %v417_v6 }
  0xb8   :  { %2527 = vmatprep.subr.bf16.mxu0 %v2526_v19  ;;  %v423_v19 = vld [vmem:[%s5331_s1 + $0xc70] sm:$0xff] }
  0xba   :  { %2833 = vmatpush3.bf16.msra.mxu1 %v2832_v24  ;;  %v431_v24 = vld [vmem:[%s5331_s1 + $0xcb0] sm:$0xff] }
  0xbb   :  { %2529 = vmatpush1.bf16.msra.mxu0 %v2528_v26  ;;  %2835 = vmatprep.subr.bf16.mxu1 %v2834_v27  ;;  %v2852_v26 = vpack.c.bf16 %v426_v20, %v423_v19  ;;  %v2548_v27 = vpack.c.bf16 %v424_v21, %v421_v18  ;;  %v2550_v31 = vpack.c.bf16 %v431_v24, %v428_v25 }
  0xbc   :  { %2531 = vmatprep.subr.bf16.mxu0 %v2530_v30  ;;  %v432_v30 = vld [vmem:[%s5331_s1 + $0xcb8] sm:$0xff] }
  0xbe   :  { %2837 = vmatpush3.bf16.msra.mxu1 %v2836_v39  ;;  %v437_v39 = vld [vmem:[%s5331_s1 + $0xce0] sm:$0xff] }
  0xbf   :  { %2533 = vmatpush1.bf16.msra.mxu0 %v2532_v40  ;;  %2839 = vmatprep.subr.bf16.mxu1 %v2838_v42  ;;  %v2856_v40 = vpack.c.bf16 %v432_v30, %v429_v29  ;;  %v433_v42 = vld [vmem:[%s5331_s1 + $0xcc0] sm:$0xff]  ;;  %v2554_v1 = vpack.c.bf16 %v437_v39, %v434_v37 }
  0xc0   :  { %2535 = vmatprep.subr.bf16.mxu0 %v2534_v38  ;;  %v435_v38 = vld [vmem:[%s5331_s1 + $0xcd0] sm:$0xff] }
  0xc2   :  { %2841 = vmatpush3.bf16.msra.mxu1 %v2840_v53 }
  0xc3   :  { %2537 = vmatpush1.bf16.msra.mxu0 %v2536_v54  ;;  %2843 = vmatprep.subr.bf16.mxu1 %v2842_v55 }
  0xc4   :  { %2539 = vmatprep.subr.bf16.mxu0 %v2538_v59 }
  0xc5   :  { %1541 = vmatmul.mubr.f32.vlgmr.msra.gmra.mrb[8].mxu1 %v3933_v52 }
  0xc6   :  { %1047 = vmatmul.mubr.f32.vlgmr.msra.gmra.mrb[0].mxu0 %v3933_v52  ;;  %2845 = vmatpush3.bf16.msra.mxu1 %v2844_v3  ;;  %v2546_v52 = vpack.c.bf16 %v425_v15, %v422_v14 }
  0xc7   :  { %2541 = vmatpush1.bf16.msra.mxu0 %v2540_v34  ;;  %2847 = vmatprep.subr.bf16.mxu1 %v2846_v4 }
  0xc8   :  { %2543 = vmatprep.subr.bf16.mxu0 %v2542_v8  ;;  %1610 = vmatprep.mubr.f32.mxu1 %v743_v13 }
  0xc9   :  { %1117 = vmatprep.mubr.f32.mxu0 %v743_v13 }
  0xca   :  { %2849 = vmatpush3.bf16.msra.mxu1 %v2848_v16 }
  0xcb   :  { %2545 = vmatpush1.bf16.msra.mxu0 %v2544_v48  ;;  %2851 = vmatprep.subr.bf16.mxu1 %v2850_v17 }
  0xcc   :  { %2547 = vmatprep.subr.bf16.mxu0 %v2546_v52 }
  0xce   :  { %2853 = vmatpush3.bf16.msra.mxu1 %v2852_v26 }
  0xcf   :  { %2549 = vmatpush1.bf16.msra.mxu0 %v2548_v27  ;;  %2855 = vmatprep.subr.bf16.mxu1 %v2854_v41 }
  0xd0   :  { %2551 = vmatprep.subr.bf16.mxu0 %v2550_v31 }
  0xd1   :  { %10 = vsyncpa [#allocation3], 0  ;;  %v440_v50 = vld [vmem:[%s5331_s1 + $0xcf8] sm:$0xff]  ;;  %v443_v53 = vld [vmem:[%s5331_s1 + $0xd10] sm:$0xff]  ;;  %v2860_v54 = vpack.c.bf16 %v438_v46, %v435_v38  ;;  %v2556_v55 = vpack.c.bf16 %v436_v45, %v433_v42  ;;  %v2862_v56 = vpack.c.bf16 %v492_v49, %v489_v47  ;;  %v728_v48 = vcombine.high %v4308_v51, %v4308_v51 }
  0xd2   :  { %2857 = vmatpush3.bf16.msra.mxu1 %v2856_v40  ;;  %v439_v57 = vld [vmem:[%s5331_s1 + $0xcf0] sm:$0xff]  ;;  %v441_v58 = vld [vmem:[%s5331_s1 + $0xd00] sm:$0xff]  ;;  %v444_v59 = vld [vmem:[%s5331_s1 + $0xd18] sm:$0xff]  ;;  %v2558_v33 = vpack.c.bf16 %v443_v53, %v440_v50  ;;  %vm766_vm0 = vcmask 523264   ;;  %vm3050_vm1 = vmmov 0   ;;  %vm1954_vm2 = vcmask 58368  }
  0xd3   :  { %2553 = vmatpush1.bf16.msra.mxu0 %v2552_v43  ;;  %2859 = vmatprep.subr.bf16.mxu1 %v2858_v44  ;;  %v442_v60 = vld [vmem:[%s5331_s1 + $0xd08] sm:$0xff]  ;;  %v495_v62 = vld [vmem:[%s5331_s1 + $0xeb0] sm:$0xff]  ;;  %v449_v3 = vld [vmem:[%s5331_s1 + $0xd40] sm:$0xff]  ;;  %v2864_v34 = vpack.c.bf16 %v444_v59, %v441_v58  ;;  %v4513_v27 = vrot.slane %v728_v48, %v3362_v11 }
  0xd4   :  { %2555 = vmatprep.subr.bf16.mxu0 %v2554_v1  ;;  %v498_v0 = vld [vmem:[%s5331_s1 + $0xec8] sm:$0xff]  ;;  %v2560_v4 = vpack.c.bf16 %v442_v60, %v439_v57  ;;  %v445_v6 = vld [vmem:[%s5331_s1 + $0xd20] sm:$0xff]  ;;  %v447_v7 = vld [vmem:[%s5331_s1 + $0xd30] sm:$0xff] }
  0xd5   :  { %v446_v2 = vld [vmem:[%s5331_s1 + $0xd28] sm:$0xff]  ;;  %v2866_v5 = vpack.c.bf16 %v498_v0, %v495_v62  ;;  %v448_v10 = vld [vmem:[%s5331_s1 + $0xd38] sm:$0xff]  ;;  %v501_v12 = vld [vmem:[%s5331_s1 + $0xee0] sm:$0xff]  ;;  %v4541_v42 = vcombine.high %v4513_v27, %v4513_v27 }
  0xd6   :  { %2861 = vmatpush3.bf16.msra.mxu1 %v2860_v54  ;;  %v450_v8 = vld [vmem:[%s5331_s1 + $0xd48] sm:$0xff]  ;;  %v2562_v9 = vpack.c.bf16 %v449_v3, %v446_v2  ;;  %v504_v13 = vld [vmem:[%s5331_s1 + $0xef8] sm:$0xff]  ;;  %v455_v15 = vld [vmem:[%s5331_s1 + $0xd70] sm:$0xff]  ;;  %v2564_v17 = vpack.c.bf16 %v448_v10, %v445_v6 }
  0xd7   :  { %2557 = vmatpush1.bf16.msra.mxu0 %v2556_v55  ;;  %2863 = vmatprep.subr.bf16.mxu1 %v2862_v56  ;;  %v452_v14 = vld [vmem:[%s5331_s1 + $0xd58] sm:$0xff]  ;;  %v2868_v16 = vpack.c.bf16 %v450_v8, %v447_v7  ;;  %v2870_v18 = vpack.c.bf16 %v504_v13, %v501_v12  ;;  %v451_v19 = vld [vmem:[%s5331_s1 + $0xd50] sm:$0xff]  ;;  %v453_v20 = vld [vmem:[%s5331_s1 + $0xd60] sm:$0xff] }
  0xd8   :  { %2559 = vmatprep.subr.bf16.mxu0 %v2558_v33  ;;  %v456_v52 = vld [vmem:[%s5331_s1 + $0xd78] sm:$0xff]  ;;  %v2566_v21 = vpack.c.bf16 %v455_v15, %v452_v14  ;;  %v454_v51 = vld [vmem:[%s5331_s1 + $0xd68] sm:$0xff]  ;;  %v555_v22 = vld [vmem:[%s5331_s1 + $0x1090] sm:$0xff] }
  0xd9   :  { %v558_v23 = vld [vmem:[%s5331_s1 + $0x10a8] sm:$0xff]  ;;  %v461_v24 = vld [vmem:[%s5331_s1 + $0xda0] sm:$0xff]  ;;  %v2872_v26 = vpack.c.bf16 %v456_v52, %v453_v20  ;;  %v2568_v41 = vpack.c.bf16 %v454_v51, %v451_v19  ;;  %v507_v30 = vld [vmem:[%s5331_s1 + $0xf10] sm:$0xff] }
  0xda   :  { %2865 = vmatpush3.bf16.msra.mxu1 %v2864_v34  ;;  %v458_v25 = vld [vmem:[%s5331_s1 + $0xd88] sm:$0xff]  ;;  %v2874_v28 = vpack.c.bf16 %v558_v23, %v555_v22  ;;  %v457_v29 = vld [vmem:[%s5331_s1 + $0xd80] sm:$0xff]  ;;  %v460_v11 = vld [vmem:[%s5331_s1 + $0xd98] sm:$0xff] }
  0xdb   :  { %2561 = vmatpush1.bf16.msra.mxu0 %v2560_v4  ;;  %2867 = vmatprep.subr.bf16.mxu1 %v2866_v5  ;;  %v510_v31 = vld [vmem:[%s5331_s1 + $0xf28] sm:$0xff]  ;;  %v2570_v32 = vpack.c.bf16 %v461_v24, %v458_v25  ;;  %v561_v35 = vld [vmem:[%s5331_s1 + $0x10c0] sm:$0xff]  ;;  %v564_v36 = vld [vmem:[%s5331_s1 + $0x10d8] sm:$0xff]  ;;  %v2572_v43 = vpack.c.bf16 %v460_v11, %v457_v29 }
  0xdc   :  { %2563 = vmatprep.subr.bf16.mxu0 %v2562_v9  ;;  %v464_v37 = vld [vmem:[%s5331_s1 + $0xdb8] sm:$0xff]  ;;  %v467_v39 = vld [vmem:[%s5331_s1 + $0xdd0] sm:$0xff]  ;;  %v2876_v40 = vpack.c.bf16 %v510_v31, %v507_v30  ;;  %v2878_v44 = vpack.c.bf16 %v564_v36, %v561_v35  ;;  %v513_v38 = vld [vmem:[%s5331_s1 + $0xf40] sm:$0xff] }
  0xdd   :  { %v463_v45 = vld [vmem:[%s5331_s1 + $0xdb0] sm:$0xff]  ;;  %v516_v46 = vld [vmem:[%s5331_s1 + $0xf58] sm:$0xff]  ;;  %v2574_v1 = vpack.c.bf16 %v467_v39, %v464_v37  ;;  %v466_v47 = vld [vmem:[%s5331_s1 + $0xdc8] sm:$0xff] }
  0xde   :  { %2869 = vmatpush3.bf16.msra.mxu1 %v2868_v16  ;;  %v567_v49 = vld [vmem:[%s5331_s1 + $0x10f0] sm:$0xff]  ;;  %v570_v50 = vld [vmem:[%s5331_s1 + $0x1108] sm:$0xff]  ;;  %v473_v54 = vld [vmem:[%s5331_s1 + $0xe00] sm:$0xff]  ;;  %v2880_v55 = vpack.c.bf16 %v516_v46, %v513_v38  ;;  %v2576_v56 = vpack.c.bf16 %v466_v47, %v463_v45 }
  0xdf   :  { %2565 = vmatpush1.bf16.msra.mxu0 %v2564_v17  ;;  %2871 = vmatprep.subr.bf16.mxu1 %v2870_v18  ;;  %v470_v53 = vld [vmem:[%s5331_s1 + $0xde8] sm:$0xff]  ;;  %v2882_v57 = vpack.c.bf16 %v570_v50, %v567_v49  ;;  %v469_v58 = vld [vmem:[%s5331_s1 + $0xde0] sm:$0xff]  ;;  %v519_v59 = vld [vmem:[%s5331_s1 + $0xf70] sm:$0xff] }
  0xe0   :  { %2567 = vmatprep.subr.bf16.mxu0 %v2566_v21  ;;  %v522_v33 = vld [vmem:[%s5331_s1 + $0xf88] sm:$0xff]  ;;  %v2578_v60 = vpack.c.bf16 %v473_v54, %v470_v53  ;;  %v472_v62 = vld [vmem:[%s5331_s1 + $0xdf8] sm:$0xff]  ;;  %v573_v0 = vld [vmem:[%s5331_s1 + $0x1120] sm:$0xff] }
  0xe1   :  { %v576_v2 = vld [vmem:[%s5331_s1 + $0x1138] sm:$0xff]  ;;  %v479_v34 = vld [vmem:[%s5331_s1 + $0xe30] sm:$0xff]  ;;  %v2884_v4 = vpack.c.bf16 %v522_v33, %v519_v59  ;;  %v2580_v5 = vpack.c.bf16 %v472_v62, %v469_v58  ;;  %v525_v8 = vld [vmem:[%s5331_s1 + $0xfa0] sm:$0xff] }
  0xe2   :  { %2873 = vmatpush3.bf16.msra.mxu1 %v2872_v26  ;;  %v476_v3 = vld [vmem:[%s5331_s1 + $0xe18] sm:$0xff]  ;;  %v2886_v6 = vpack.c.bf16 %v576_v2, %v573_v0  ;;  %v475_v7 = vld [vmem:[%s5331_s1 + $0xe10] sm:$0xff]  ;;  %v478_v12 = vld [vmem:[%s5331_s1 + $0xe28] sm:$0xff] }
  0xe3   :  { %2569 = vmatpush1.bf16.msra.mxu0 %v2568_v41  ;;  %2875 = vmatprep.subr.bf16.mxu1 %v2874_v28  ;;  %v528_v9 = vld [vmem:[%s5331_s1 + $0xfb8] sm:$0xff]  ;;  %v2582_v10 = vpack.c.bf16 %v479_v34, %v476_v3  ;;  %v579_v13 = vld [vmem:[%s5331_s1 + $0x1150] sm:$0xff]  ;;  %v582_v14 = vld [vmem:[%s5331_s1 + $0x1168] sm:$0xff]  ;;  %v2584_v17 = vpack.c.bf16 %v478_v12, %v475_v7 }
  0xe4   :  { %2571 = vmatprep.subr.bf16.mxu0 %v2570_v32  ;;  %v482_v15 = vld [vmem:[%s5331_s1 + $0xe48] sm:$0xff]  ;;  %v485_v16 = vld [vmem:[%s5331_s1 + $0xe60] sm:$0xff]  ;;  %v2888_v48 = vpack.c.bf16 %v528_v9, %v525_v8  ;;  %v2890_v18 = vpack.c.bf16 %v582_v14, %v579_v13  ;;  %v531_v20 = vld [vmem:[%s5331_s1 + $0xfd0] sm:$0xff]  ;;  %v3049_v14 = vmov 0.0|0.0  }
  0xe5   :  { %1611 = vmatmul.mubr.f32.vlgmr.msra.gmra.mrb[10].mxu1 %v4330_v63  ;;  %v481_v19 = vld [vmem:[%s5331_s1 + $0xe40] sm:$0xff]  ;;  %v534_v52 = vld [vmem:[%s5331_s1 + $0xfe8] sm:$0xff]  ;;  %v2586_v21 = vpack.c.bf16 %v485_v16, %v482_v15  ;;  %v484_v51 = vld [vmem:[%s5331_s1 + $0xe58] sm:$0xff] }
  0xe6   :  { %2877 = vmatpush3.bf16.msra.mxu1 %v2876_v40  ;;  %1680 = vmatprep.mubr.f32.mxu1 %v4541_v42  ;;  %v585_v22 = vld [vmem:[%s5331_s1 + $0x1180] sm:$0xff]  ;;  %v588_v23 = vld [vmem:[%s5331_s1 + $0x1198] sm:$0xff]  ;;  %v491_v24 = vld [vmem:[%s5331_s1 + $0xe90] sm:$0xff]  ;;  %v2892_v26 = vpack.c.bf16 %v534_v52, %v531_v20  ;;  %v2588_v41 = vpack.c.bf16 %v484_v51, %v481_v19 }
  0xe7   :  { %2573 = vmatpush1.bf16.msra.mxu0 %v2572_v43  ;;  %2879 = vmatprep.subr.bf16.mxu1 %v2878_v44  ;;  %v488_v25 = vld [vmem:[%s5331_s1 + $0xe78] sm:$0xff]  ;;  %v2894_v28 = vpack.c.bf16 %v588_v23, %v585_v22  ;;  %v487_v29 = vld [vmem:[%s5331_s1 + $0xe70] sm:$0xff]  ;;  %v537_v30 = vld [vmem:[%s5331_s1 + $0x1000] sm:$0xff] }
  0xe8   :  { %2575 = vmatprep.subr.bf16.mxu0 %v2574_v1  ;;  %v540_v31 = vld [vmem:[%s5331_s1 + $0x1018] sm:$0xff]  ;;  %v2590_v32 = vpack.c.bf16 %v491_v24, %v488_v25  ;;  %v490_v11 = vld [vmem:[%s5331_s1 + $0xe88] sm:$0xff]  ;;  %v591_v35 = vld [vmem:[%s5331_s1 + $0x11b0] sm:$0xff] }
  0xe9   :  { %v594_v36 = vld [vmem:[%s5331_s1 + $0x11c8] sm:$0xff]  ;;  %v497_v39 = vld [vmem:[%s5331_s1 + $0xec0] sm:$0xff]  ;;  %v2896_v40 = vpack.c.bf16 %v540_v31, %v537_v30  ;;  %v2592_v43 = vpack.c.bf16 %v490_v11, %v487_v29  ;;  %v543_v38 = vld [vmem:[%s5331_s1 + $0x1030] sm:$0xff] }
  0xea   :  { %2881 = vmatpush3.bf16.msra.mxu1 %v2880_v55  ;;  %v494_v37 = vld [vmem:[%s5331_s1 + $0xea8] sm:$0xff]  ;;  %v2898_v44 = vpack.c.bf16 %v594_v36, %v591_v35  ;;  %v493_v45 = vld [vmem:[%s5331_s1 + $0xea0] sm:$0xff]  ;;  %v496_v47 = vld [vmem:[%s5331_s1 + $0xeb8] sm:$0xff] }
  0xeb   :  { %2577 = vmatpush1.bf16.msra.mxu0 %v2576_v56  ;;  %2883 = vmatprep.subr.bf16.mxu1 %v2882_v57  ;;  %v546_v46 = vld [vmem:[%s5331_s1 + $0x1048] sm:$0xff]  ;;  %v2594_v1 = vpack.c.bf16 %v497_v39, %v494_v37  ;;  %v597_v49 = vld [vmem:[%s5331_s1 + $0x11e0] sm:$0xff]  ;;  %v600_v50 = vld [vmem:[%s5331_s1 + $0x11f8] sm:$0xff]  ;;  %v2596_v56 = vpack.c.bf16 %v496_v47, %v493_v45 }
  0xec   :  { %2579 = vmatprep.subr.bf16.mxu0 %v2578_v60  ;;  %v500_v53 = vld [vmem:[%s5331_s1 + $0xed8] sm:$0xff]  ;;  %v503_v54 = vld [vmem:[%s5331_s1 + $0xef0] sm:$0xff]  ;;  %v2900_v55 = vpack.c.bf16 %v546_v46, %v543_v38  ;;  %v2902_v57 = vpack.c.bf16 %v600_v50, %v597_v49  ;;  %v549_v58 = vld [vmem:[%s5331_s1 + $0x1060] sm:$0xff] }
  0xed   :  { %v552_v59 = vld [vmem:[%s5331_s1 + $0x1078] sm:$0xff]  ;;  %v2598_v33 = vpack.c.bf16 %v503_v54, %v500_v53  ;;  %v499_v60 = vld [vmem:[%s5331_s1 + $0xed0] sm:$0xff]  ;;  %v502_v62 = vld [vmem:[%s5331_s1 + $0xee8] sm:$0xff] }
  0xee   :  { %2885 = vmatpush3.bf16.msra.mxu1 %v2884_v4  ;;  %v506_v0 = vld [vmem:[%s5331_s1 + $0xf08] sm:$0xff]  ;;  %v509_v2 = vld [vmem:[%s5331_s1 + $0xf20] sm:$0xff]  ;;  %v2904_v3 = vpack.c.bf16 %v552_v59, %v549_v58  ;;  %v2600_v34 = vpack.c.bf16 %v502_v62, %v499_v60  ;;  %v603_v4 = vld [vmem:[%s5331_s1 + $0x1210] sm:$0xff] }
  0xef   :  { %2581 = vmatpush1.bf16.msra.mxu0 %v2580_v5  ;;  %2887 = vmatprep.subr.bf16.mxu1 %v2886_v6  ;;  %v606_v5 = vld [vmem:[%s5331_s1 + $0x1228] sm:$0xff]  ;;  %v2602_v6 = vpack.c.bf16 %v509_v2, %v506_v0  ;;  %v505_v7 = vld [vmem:[%s5331_s1 + $0xf00] sm:$0xff]  ;;  %v508_v8 = vld [vmem:[%s5331_s1 + $0xf18] sm:$0xff] }
  0xf0   :  { %2583 = vmatprep.subr.bf16.mxu0 %v2582_v10  ;;  %v512_v9 = vld [vmem:[%s5331_s1 + $0xf38] sm:$0xff]  ;;  %v515_v10 = vld [vmem:[%s5331_s1 + $0xf50] sm:$0xff]  ;;  %v2907_v13 = vpack.c.bf16 %v606_v5, %v603_v4  ;;  %v2604_v15 = vpack.c.bf16 %v508_v8, %v505_v7  ;;  %v609_v16 = vld [vmem:[%s5331_s1 + $0x1240] sm:$0xff] }
  0xf1   :  { %v4728_v12 = vld.sshfl [vmem:[%s5330_s0 + $0x18] sm:$0x33 pattern:$0x76325410]  ;;  %v514_v19 = vld [vmem:[%s5331_s1 + $0xf48] sm:$0xff]  ;;  %v615_v23 = vld [vmem:[%s5331_s1 + $0x1270] sm:$0xff] }
  0xf2   :  { %2889 = vmatpush3.bf16.msra.mxu1 %v2888_v48  ;;  %v612_v48 = vld [vmem:[%s5331_s1 + $0x1258] sm:$0xff]  ;;  %v4745_v20 = vcombine.high %v4728_v12, %v4728_v12  ;;  %v518_v52 = vld [vmem:[%s5331_s1 + $0xf68] sm:$0xff]  ;;  %v621_v31 = vld [vmem:[%s5331_s1 + $0x12a0] sm:$0xff] }
  0xf3   :  { %2585 = vmatpush1.bf16.msra.mxu0 %v2584_v17  ;;  %2891 = vmatprep.subr.bf16.mxu1 %v2890_v18  ;;  %v2606_v17 = vpack.c.bf16 %v515_v10, %v512_v9  ;;  %v511_v18 = vld [vmem:[%s5331_s1 + $0xf30] sm:$0xff]  ;;  %v2910_v51 = vpack.c.bf16 %v612_v48, %v609_v16  ;;  %v618_v25 = vld [vmem:[%s5331_s1 + $0x1288] sm:$0xff]  ;;  %v533_v37 = vld [vmem:[%s5331_s1 + $0xfe0] sm:$0xff] }
  0xf4   :  { %2587 = vmatprep.subr.bf16.mxu0 %v2586_v21  ;;  %v521_v21 = vld [vmem:[%s5331_s1 + $0xf80] sm:$0xff]  ;;  %v2608_v22 = vpack.c.bf16 %v514_v19, %v511_v18  ;;  %v2913_v29 = vpack.c.bf16 %v618_v25, %v615_v23  ;;  %v526_v35 = vld [vmem:[%s5331_s1 + $0xfa8] sm:$0xff]  ;;  %v532_v46 = vld [vmem:[%s5331_s1 + $0xfd8] sm:$0xff] }
  0xf5   :  { %v2610_v24 = vpack.c.bf16 %v521_v21, %v518_v52  ;;  %v530_v36 = vld [vmem:[%s5331_s1 + $0xfc8] sm:$0xff]  ;;  %v529_v38 = vld [vmem:[%s5331_s1 + $0xfc0] sm:$0xff]  ;;  %v539_v47 = vld [vmem:[%s5331_s1 + $0x1010] sm:$0xff] }
  0xf6   :  { %2893 = vmatpush3.bf16.msra.mxu1 %v2892_v26  ;;  %v520_v26 = vld [vmem:[%s5331_s1 + $0xf78] sm:$0xff]  ;;  %v2618_v45 = vpack.c.bf16 %v533_v37, %v530_v36  ;;  %v2620_v50 = vpack.c.bf16 %v532_v46, %v529_v38  ;;  %v633_v53 = vld [vmem:[%s5331_s1 + $0x1300] sm:$0xff]  ;;  %v542_v58 = vld [vmem:[%s5331_s1 + $0x1028] sm:$0xff] }
  0xf7   :  { %2589 = vmatpush1.bf16.msra.mxu0 %v2588_v41  ;;  %2895 = vmatprep.subr.bf16.mxu1 %v2894_v28  ;;  %v524_v41 = vld [vmem:[%s5331_s1 + $0xf98] sm:$0xff]  ;;  %v527_v28 = vld [vmem:[%s5331_s1 + $0xfb0] sm:$0xff]  ;;  %v545_v59 = vld [vmem:[%s5331_s1 + $0x1040] sm:$0xff] }
  0xf8   :  { %2591 = vmatprep.subr.bf16.mxu0 %v2590_v32  ;;  %v624_v32 = vld [vmem:[%s5331_s1 + $0x12b8] sm:$0xff]  ;;  %v2614_v11 = vpack.c.bf16 %v527_v28, %v524_v41  ;;  %v639_v62 = vld [vmem:[%s5331_s1 + $0x1330] sm:$0xff]  ;;  %v642_v0 = vld [vmem:[%s5331_s1 + $0x1348] sm:$0xff]  ;;  %v2626_v2 = vpack.c.bf16 %v545_v59, %v542_v58 }
  0xf9   :  { %v2916_v39 = vpack.c.bf16 %v624_v32, %v621_v31  ;;  %v636_v54 = vld [vmem:[%s5331_s1 + $0x1318] sm:$0xff]  ;;  %v2925_v8 = vpack.c.bf16 %v642_v0, %v639_v62  ;;  %v645_v10 = vld [vmem:[%s5331_s1 + $0x1360] sm:$0xff]  ;;  %v547_v16 = vld [vmem:[%s5331_s1 + $0x1050] sm:$0xff] }
  0xfa   :  { %2897 = vmatpush3.bf16.msra.mxu1 %v2896_v40  ;;  %v548_v5 = vld [vmem:[%s5331_s1 + $0x1058] sm:$0xff]  ;;  %v550_v48 = vld [vmem:[%s5331_s1 + $0x1068] sm:$0xff]  ;;  %v557_v18 = vld [vmem:[%s5331_s1 + $0x10a0] sm:$0xff] }
  0xfb   :  { %2593 = vmatpush1.bf16.msra.mxu0 %v2592_v43  ;;  %2899 = vmatprep.subr.bf16.mxu1 %v2898_v44  ;;  %v627_v43 = vld [vmem:[%s5331_s1 + $0x12d0] sm:$0xff]  ;;  %v630_v44 = vld [vmem:[%s5331_s1 + $0x12e8] sm:$0xff]  ;;  %v2632_v52 = vpack.c.bf16 %v550_v48, %v547_v16  ;;  %v553_v23 = vld [vmem:[%s5331_s1 + $0x1080] sm:$0xff] }
  0xfc   :  { %2595 = vmatprep.subr.bf16.mxu0 %v2594_v1  ;;  %v536_v1 = vld [vmem:[%s5331_s1 + $0xff8] sm:$0xff]  ;;  %v2919_v49 = vpack.c.bf16 %v630_v44, %v627_v43  ;;  %v651_v21 = vld [vmem:[%s5331_s1 + $0x1390] sm:$0xff]  ;;  %v657_v28 = vld [vmem:[%s5331_s1 + $0x13c0] sm:$0xff] }
  0xfd   :  { %v556_v25 = vld [vmem:[%s5331_s1 + $0x1098] sm:$0xff]  ;;  %v559_v31 = vld [vmem:[%s5331_s1 + $0x10b0] sm:$0xff]  ;;  %v562_v32 = vld [vmem:[%s5331_s1 + $0x10c8] sm:$0xff] }
  0xfe   :  { %2901 = vmatpush3.bf16.msra.mxu1 %v2900_v55  ;;  %v2622_v55 = vpack.c.bf16 %v539_v47, %v536_v1  ;;  %v2636_v41 = vpack.c.bf16 %v556_v25, %v553_v23  ;;  %v2640_v36 = vpack.c.bf16 %v562_v32, %v559_v31  ;;  %v663_v37 = vld [vmem:[%s5331_s1 + $0x13f0] sm:$0xff]  ;;  %v565_v43 = vld [vmem:[%s5331_s1 + $0x10e0] sm:$0xff]  ;;  %v568_v44 = vld [vmem:[%s5331_s1 + $0x10f8] sm:$0xff] }
  0xff   :  { %2597 = vmatpush1.bf16.msra.mxu0 %v2596_v56  ;;  %2903 = vmatprep.subr.bf16.mxu1 %v2902_v57  ;;  %v535_v56 = vld [vmem:[%s5331_s1 + $0xff0] sm:$0xff]  ;;  %v538_v57 = vld [vmem:[%s5331_s1 + $0x1008] sm:$0xff]  ;;  %v2644_v1 = vpack.c.bf16 %v568_v44, %v565_v43  ;;  %v669_v47 = vld [vmem:[%s5331_s1 + $0x1420] sm:$0xff] }
 0x100   :  { %2599 = vmatprep.subr.bf16.mxu0 %v2598_v33  ;;  %v2922_v33 = vpack.c.bf16 %v636_v54, %v633_v53  ;;  %v2624_v60 = vpack.c.bf16 %v538_v57, %v535_v56  ;;  %v575_v38 = vld [vmem:[%s5331_s1 + $0x1130] sm:$0xff]  ;;  %v574_v54 = vld [vmem:[%s5331_s1 + $0x1128] sm:$0xff]  ;;  %v581_v56 = vld [vmem:[%s5331_s1 + $0x1160] sm:$0xff] }
 0x101   :  { %v571_v53 = vld [vmem:[%s5331_s1 + $0x1110] sm:$0xff]  ;;  %v584_v62 = vld [vmem:[%s5331_s1 + $0x1178] sm:$0xff]  ;;  %v602_v23 = vld [vmem:[%s5331_s1 + $0x1208] sm:$0xff] }
 0x102   :  { %2905 = vmatpush3.bf16.msra.mxu1 %v2904_v3  ;;  %v541_v3 = vld [vmem:[%s5331_s1 + $0x1020] sm:$0xff]  ;;  %v2648_v58 = vpack.c.bf16 %v574_v54, %v571_v53  ;;  %v587_v0 = vld [vmem:[%s5331_s1 + $0x1190] sm:$0xff]  ;;  %v596_v48 = vld [vmem:[%s5331_s1 + $0x11d8] sm:$0xff]  ;;  %v685_v54 = vsub.s32 2, %v3335_v61 }
 0x103   :  { %2601 = vmatpush1.bf16.msra.mxu0 %v2600_v34  ;;  %2906 = vmatprep.subr.bf16.mxu1 %v3049_v14  ;;  %v544_v34 = vld [vmem:[%s5331_s1 + $0x1038] sm:$0xff]  ;;  %v605_v25 = vld [vmem:[%s5331_s1 + $0x1220] sm:$0xff]  ;;  %v607_v32 = vld [vmem:[%s5331_s1 + $0x1230] sm:$0xff] }
 0x104   :  { %2603 = vmatprep.subr.bf16.mxu0 %v2602_v6  ;;  %v551_v6 = vld [vmem:[%s5331_s1 + $0x1070] sm:$0xff]  ;;  %v2628_v9 = vpack.c.bf16 %v544_v34, %v541_v3  ;;  %v2654_v3 = vpack.c.bf16 %v587_v0, %v584_v62  ;;  %v620_v43 = vld [vmem:[%s5331_s1 + $0x1298] sm:$0xff]  ;;  %v638_v0 = vld [vmem:[%s5331_s1 + $0x1328] sm:$0xff] }
 0x105   :  { %1681 = vmatmul.mubr.f32.vlgmr.msra.gmra.mrb[12].mxu1 %v4513_v27  ;;  %v583_v34 = vld [vmem:[%s5331_s1 + $0x1170] sm:$0xff]  ;;  %v628_v53 = vld [vmem:[%s5331_s1 + $0x12d8] sm:$0xff] }
 0x106   :  { %1118 = vmatmul.mubr.f32.vlgmr.msra.gmra.mrb[0].mxu0 %v4330_v63  ;;  %2908 = vmatpush1.bf16.msra.mxu1 %v2907_v13  ;;  %v517_v63 = vld [vmem:[%s5331_s1 + $0xf60] sm:$0xff]  ;;  %v648_v13 = vld [vmem:[%s5331_s1 + $0x1378] sm:$0xff] }
 0x107   :  { %2605 = vmatpush1.bf16.msra.mxu0 %v2604_v15  ;;  %2909 = vmatprep.subr.bf16.mxu1 %v3049_v14  ;;  %v2612_v30 = vpack.c.bf16 %v520_v26, %v517_v63  ;;  %v2630_v15 = vpack.c.bf16 %v551_v6, %v548_v5  ;;  %v2928_v19 = vpack.c.bf16 %v648_v13, %v645_v10  ;;  %v563_v63 = vld [vmem:[%s5331_s1 + $0x10d0] sm:$0xff]  ;;  %v586_v5 = vld [vmem:[%s5331_s1 + $0x1188] sm:$0xff]  ;;  %v589_v13 = vld [vmem:[%s5331_s1 + $0x11a0] sm:$0xff] }
 0x108   :  { %2607 = vmatprep.subr.bf16.mxu0 %v2606_v17  ;;  %1983 = vmatprep.mubr.msk.f32.mxu1 %vm766_vm0, %v4745_v20  ;;  %v554_v17 = vld [vmem:[%s5331_s1 + $0x1088] sm:$0xff] }
 0x109   :  { %1188 = vmatprep.mubr.f32.mxu0 %v4541_v42  ;;  %v523_v42 = vld [vmem:[%s5331_s1 + $0xf90] sm:$0xff]  ;;  %v590_v6 = vld [vmem:[%s5331_s1 + $0x11a8] sm:$0xff] }
 0x10a   :  { %2911 = vmatpush1.bf16.msra.mxu1 %v2910_v51  ;;  %v2616_v40 = vpack.c.bf16 %v526_v35, %v523_v42  ;;  %v654_v51 = vld [vmem:[%s5331_s1 + $0x13a8] sm:$0xff]  ;;  %v569_v42 = vld [vmem:[%s5331_s1 + $0x1100] sm:$0xff] }
 0x10b   :  { %2609 = vmatpush1.bf16.msra.mxu0 %v2608_v22  ;;  %2912 = vmatprep.subr.bf16.mxu1 %v3049_v14  ;;  %v2634_v22 = vpack.c.bf16 %v557_v18, %v554_v17  ;;  %v2931_v26 = vpack.c.bf16 %v654_v51, %v651_v21  ;;  %v599_v17 = vld [vmem:[%s5331_s1 + $0x11f0] sm:$0xff] }
 0x10c   :  { %2611 = vmatprep.subr.bf16.mxu0 %v2610_v24  ;;  %v560_v24 = vld [vmem:[%s5331_s1 + $0x10b8] sm:$0xff]  ;;  %v2662_v21 = vpack.c.bf16 %v599_v17, %v596_v48  ;;  %v595_v51 = vld [vmem:[%s5331_s1 + $0x11d0] sm:$0xff] }
 0x10e   :  { %2914 = vmatpush1.bf16.msra.mxu1 %v2913_v29  ;;  %v660_v29 = vld [vmem:[%s5331_s1 + $0x13d8] sm:$0xff] }
 0x10f   :  { %2613 = vmatpush1.bf16.msra.mxu0 %v2612_v30  ;;  %2915 = vmatprep.subr.bf16.mxu1 %v3049_v14  ;;  %v2638_v30 = vpack.c.bf16 %v563_v63, %v560_v24  ;;  %v2934_v35 = vpack.c.bf16 %v660_v29, %v657_v28  ;;  %v2666_v63 = vpack.c.bf16 %v605_v25, %v602_v23  ;;  %v608_v28 = vld [vmem:[%s5331_s1 + $0x1238] sm:$0xff]  ;;  %v611_v29 = vld [vmem:[%s5331_s1 + $0x1250] sm:$0xff]  ;;  %v649_v25 = vld [vmem:[%s5331_s1 + $0x1380] sm:$0xff] }
 0x110   :  { %2615 = vmatprep.subr.bf16.mxu0 %v2614_v11  ;;  %v566_v11 = vld [vmem:[%s5331_s1 + $0x10e8] sm:$0xff]  ;;  %v2670_v31 = vpack.c.bf16 %v611_v29, %v608_v28  ;;  %v655_v29 = vld [vmem:[%s5331_s1 + $0x13b0] sm:$0xff] }
 0x112   :  { %2917 = vmatpush1.bf16.msra.mxu1 %v2916_v39  ;;  %v666_v39 = vld [vmem:[%s5331_s1 + $0x1408] sm:$0xff] }
 0x113   :  { %2617 = vmatpush1.bf16.msra.mxu0 %v2616_v40  ;;  %2918 = vmatprep.subr.bf16.mxu1 %v3049_v14  ;;  %v2642_v40 = vpack.c.bf16 %v569_v42, %v566_v11  ;;  %v2937_v46 = vpack.c.bf16 %v666_v39, %v663_v37  ;;  %v610_v11 = vld [vmem:[%s5331_s1 + $0x1248] sm:$0xff]  ;;  %v613_v39 = vld [vmem:[%s5331_s1 + $0x1260] sm:$0xff] }
 0x114   :  { %2619 = vmatprep.subr.bf16.mxu0 %v2618_v45  ;;  %v572_v45 = vld [vmem:[%s5331_s1 + $0x1118] sm:$0xff]  ;;  %v614_v42 = vld [vmem:[%s5331_s1 + $0x1268] sm:$0xff] }
 0x116   :  { %2920 = vmatpush1.bf16.msra.mxu1 %v2919_v49  ;;  %v672_v49 = vld [vmem:[%s5331_s1 + $0x1438] sm:$0xff] }
 0x117   :  { %2621 = vmatpush1.bf16.msra.mxu0 %v2620_v50  ;;  %2921 = vmatprep.subr.bf16.mxu1 %v3049_v14  ;;  %v2646_v50 = vpack.c.bf16 %v575_v38, %v572_v45  ;;  %v2940_v57 = vpack.c.bf16 %v672_v49, %v669_v47  ;;  %v619_v45 = vld [vmem:[%s5331_s1 + $0x1290] sm:$0xff]  ;;  %v622_v38 = vld [vmem:[%s5331_s1 + $0x12a8] sm:$0xff] }
 0x118   :  { %2623 = vmatprep.subr.bf16.mxu0 %v2622_v55  ;;  %v4847_v4 = vpop.f32.mrb[0].mxu1  ;;  %v578_v55 = vld [vmem:[%s5331_s1 + $0x1148] sm:$0xff]  ;;  %v2680_v47 = vpack.c.bf16 %v622_v38, %v619_v45 }
 0x119   :  { %v4855_v7 = vpop.f32.mrb[1].mxu1  ;;  %v2650_v59 = vpack.c.bf16 %v581_v56, %v578_v55  ;;  %v632_v55 = vld [vmem:[%s5331_s1 + $0x12f8] sm:$0xff]  ;;  %v635_v56 = vld [vmem:[%s5331_s1 + $0x1310] sm:$0xff] }
 0x11a   :  { %2923 = vmatpush1.bf16.msra.mxu1 %v2922_v33  ;;  %v577_v33 = vld [vmem:[%s5331_s1 + $0x1140] sm:$0xff] }
 0x11b   :  { %2625 = vmatpush1.bf16.msra.mxu0 %v2624_v60  ;;  %2924 = vmatprep.subr.bf16.mxu1 %v3049_v14  ;;  %v580_v60 = vld [vmem:[%s5331_s1 + $0x1158] sm:$0xff] }
 0x11c   :  { %2627 = vmatprep.subr.bf16.mxu0 %v2626_v2  ;;  %v2652_v2 = vpack.c.bf16 %v580_v60, %v577_v33  ;;  %v631_v33 = vld [vmem:[%s5331_s1 + $0x12f0] sm:$0xff]  ;;  %v634_v60 = vld [vmem:[%s5331_s1 + $0x1308] sm:$0xff] }
 0x11e   :  { %2926 = vmatpush1.bf16.msra.mxu1 %v2925_v8  ;;  %v593_v8 = vld [vmem:[%s5331_s1 + $0x11c0] sm:$0xff] }
 0x11f   :  { %2629 = vmatpush1.bf16.msra.mxu0 %v2628_v9  ;;  %2927 = vmatprep.subr.bf16.mxu1 %v3049_v14  ;;  %v2656_v9 = vpack.c.bf16 %v586_v5, %v583_v34  ;;  %v2658_v10 = vpack.c.bf16 %v593_v8, %v590_v6  ;;  %v637_v5 = vld [vmem:[%s5331_s1 + $0x1320] sm:$0xff]  ;;  %v640_v6 = vld [vmem:[%s5331_s1 + $0x1338] sm:$0xff] }
 0x120   :  { %2631 = vmatprep.subr.bf16.mxu0 %v2630_v15  ;;  %v592_v15 = vld [vmem:[%s5331_s1 + $0x11b8] sm:$0xff]  ;;  %v2692_v48 = vpack.c.bf16 %v640_v6, %v637_v5  ;;  %v1781_v5 = vld [vmem:[%s5333_s3 + $0xb0] sm:$0xff] }
 0x121   :  { %v1782_v6 = vld [vmem:[%s5333_s3 + $0xb8] sm:$0xff] }
 0x122   :  { %2929 = vmatpush1.bf16.msra.mxu1 %v2928_v19 }
 0x123   :  { %2633 = vmatpush1.bf16.msra.mxu0 %v2632_v52  ;;  %2930 = vmatprep.subr.bf16.mxu1 %v3049_v14  ;;  %v2660_v52 = vpack.c.bf16 %v592_v15, %v589_v13  ;;  %v647_v13 = vld [vmem:[%s5331_s1 + $0x1370] sm:$0xff] }
 0x124   :  { %2635 = vmatprep.subr.bf16.mxu0 %v2634_v22  ;;  %v598_v22 = vld [vmem:[%s5331_s1 + $0x11e8] sm:$0xff] }
 0x125   :  { %v2664_v24 = vpack.c.bf16 %v598_v22, %v595_v51  ;;  %v653_v51 = vld [vmem:[%s5331_s1 + $0x13a0] sm:$0xff] }
 0x126   :  { %2932 = vmatpush1.bf16.msra.mxu1 %v2931_v26  ;;  %v601_v26 = vld [vmem:[%s5331_s1 + $0x1200] sm:$0xff] }
 0x127   :  { %2637 = vmatpush1.bf16.msra.mxu0 %v2636_v41  ;;  %2933 = vmatprep.subr.bf16.mxu1 %v3049_v14  ;;  %v604_v41 = vld [vmem:[%s5331_s1 + $0x1218] sm:$0xff] }
 0x128   :  { %2639 = vmatprep.subr.bf16.mxu0 %v2638_v30  ;;  %v2668_v30 = vpack.c.bf16 %v604_v41, %v601_v26  ;;  %v659_v26 = vld [vmem:[%s5331_s1 + $0x13d0] sm:$0xff] }
 0x12a   :  { %2935 = vmatpush1.bf16.msra.mxu1 %v2934_v35  ;;  %v617_v35 = vld [vmem:[%s5331_s1 + $0x1280] sm:$0xff] }
 0x12b   :  { %2641 = vmatpush1.bf16.msra.mxu0 %v2640_v36  ;;  %2936 = vmatprep.subr.bf16.mxu1 %v3049_v14  ;;  %v2672_v36 = vpack.c.bf16 %v610_v11, %v607_v32  ;;  %v2674_v37 = vpack.c.bf16 %v617_v35, %v614_v42  ;;  %v665_v32 = vld [vmem:[%s5331_s1 + $0x1400] sm:$0xff] }
 0x12c   :  { %2643 = vmatprep.subr.bf16.mxu0 %v2642_v40  ;;  %v616_v40 = vld [vmem:[%s5331_s1 + $0x1278] sm:$0xff]  ;;  %v661_v35 = vld [vmem:[%s5331_s1 + $0x13e0] sm:$0xff] }
 0x12e   :  { %2938 = vmatpush1.bf16.msra.mxu1 %v2937_v46  ;;  %v626_v46 = vld [vmem:[%s5331_s1 + $0x12c8] sm:$0xff] }
 0x12f   :  { %2645 = vmatpush1.bf16.msra.mxu0 %v2644_v1  ;;  %2939 = vmatprep.subr.bf16.mxu1 %v3049_v14  ;;  %v629_v1 = vld [vmem:[%s5331_s1 + $0x12e0] sm:$0xff] }
 0x130   :  { %2647 = vmatprep.subr.bf16.mxu0 %v2646_v50  ;;  %v2682_v49 = vpack.c.bf16 %v629_v1, %v626_v46  ;;  %v625_v50 = vld [vmem:[%s5331_s1 + $0x12c0] sm:$0xff] }
 0x132   :  { %2941 = vmatpush1.bf16.msra.mxu1 %v2940_v57  ;;  %v2684_v57 = vpack.c.bf16 %v628_v53, %v625_v50  ;;  %v1759_v50 = vld [vmem:[%s5333_s3] sm:$0xff] }
 0x133   :  { %2649 = vmatpush1.bf16.msra.mxu0 %v2648_v58  ;;  %v5071_v58 = vld [vmem:[%s5332_s2] sm:$0x7] }
 0x134   :  { %2651 = vmatprep.subr.bf16.mxu0 %v2650_v59  ;;  %v2686_v59 = vpack.c.bf16 %v635_v56, %v632_v55  ;;  %v686_v62 = vrot.slane %v5071_v58, %v685_v54  ;;  %v1777_v54 = vld [vmem:[%s5333_s3 + $0x90] sm:$0xff]  ;;  %v1778_v55 = vld [vmem:[%s5333_s3 + $0x98] sm:$0xff] }
 0x135   :  { %1751 = vmatmul.mubr.f32.vlgmr.msra.gmra.mrb[14].mxu1 %v4728_v12 }
 0x137   :  { %2653 = vmatpush1.bf16.msra.mxu0 %v2652_v2  ;;  %v641_v2 = vld [vmem:[%s5331_s1 + $0x1340] sm:$0xff] }
 0x138   :  { %2655 = vmatprep.subr.bf16.mxu0 %v2654_v3  ;;  %v2017_v16 = vpop.f32.mrb[2].mxu1  ;;  %v2688_v3 = vpack.c.bf16 %v634_v60, %v631_v33  ;;  %v2690_v34 = vpack.c.bf16 %v641_v2, %v638_v0  ;;  %v1762_v33 = vld [vmem:[%s5333_s3 + $0x18] sm:$0xff]  ;;  %v1779_v60 = vld [vmem:[%s5333_s3 + $0xa0] sm:$0xff] }
 0x139   :  { %v2018_v18 = vpop.f32.mrb[3].mxu1 }
 0x13a   :  { %v4990_v19 = vadd.f32 %v2018_v18, %v2017_v16  ;;  %v643_v18 = vld [vmem:[%s5331_s1 + $0x1350] sm:$0xff] }
 0x13b   :  { %2657 = vmatpush1.bf16.msra.mxu0 %v2656_v9 }
 0x13c   :  { %2659 = vmatprep.subr.bf16.mxu0 %v2658_v10  ;;  %v1333_v8 = vadd.f32 %v4990_v19, %v686_v62  ;;  %v644_v10 = vld [vmem:[%s5331_s1 + $0x1358] sm:$0xff]  ;;  %v646_v19 = vld [vmem:[%s5331_s1 + $0x1368] sm:$0xff] }
 0x13d   :  { %v2694_v17 = vpack.c.bf16 %v647_v13, %v644_v10  ;;  %v2696_v22 = vpack.c.bf16 %v646_v19, %v643_v18  ;;  %v1780_v62 = vld [vmem:[%s5333_s3 + $0xa8] sm:$0xff]  ;;  %v1765_v10 = vld [vmem:[%s5333_s3 + $0x30] sm:$0xff]  ;;  %v1766_v13 = vld [vmem:[%s5333_s3 + $0x38] sm:$0xff] }
 0x13e   :  { %v2950_v2 = vpack.c.bf16 %v1780_v62, %v1779_v60  ;;  %v1767_v19 = vld [vmem:[%s5333_s3 + $0x40] sm:$0xff] }
 0x13f   :  { %2661 = vmatpush1.bf16.msra.mxu0 %v2660_v52 }
 0x140   :  { %2663 = vmatprep.subr.bf16.mxu0 %v2662_v21  ;;  %v650_v21 = vld [vmem:[%s5331_s1 + $0x1388] sm:$0xff] }
 0x141   :  { %v2698_v23 = vpack.c.bf16 %v653_v51, %v650_v21  ;;  %v1785_v51 = vld [vmem:[%s5333_s3 + $0xd0] sm:$0xff] }
 0x143   :  { %2665 = vmatpush1.bf16.msra.mxu0 %v2664_v24  ;;  %v652_v24 = vld [vmem:[%s5331_s1 + $0x1398] sm:$0xff] }
 0x144   :  { %2667 = vmatprep.subr.bf16.mxu0 %v2666_v63  ;;  %v656_v63 = vld [vmem:[%s5331_s1 + $0x13b8] sm:$0xff]  ;;  %v2700_v41 = vpack.c.bf16 %v652_v24, %v649_v25 }
 0x145   :  { %v2702_v28 = vpack.c.bf16 %v659_v26, %v656_v63  ;;  %v1769_v26 = vld [vmem:[%s5333_s3 + $0x50] sm:$0xff] }
 0x146   :  { %1189 = vmatmul.mubr.f32.vlgmr.msra.gmra.mrb[0].mxu0 %v4513_v27  ;;  %v623_v27 = vld [vmem:[%s5331_s1 + $0x12b0] sm:$0xff] }
 0x147   :  { %2669 = vmatpush1.bf16.msra.mxu0 %v2668_v30  ;;  %1982 = vmatprep.mubr.msk.f32.mxu0 %vm766_vm0, %v4745_v20  ;;  %v2676_v20 = vpack.c.bf16 %v616_v40, %v613_v39  ;;  %v2678_v44 = vpack.c.bf16 %v623_v27, %v620_v43  ;;  %v658_v30 = vld [vmem:[%s5331_s1 + $0x13c8] sm:$0xff]  ;;  %v671_v39 = vld [vmem:[%s5331_s1 + $0x1430] sm:$0xff] }
 0x148   :  { %2671 = vmatprep.subr.bf16.mxu0 %v2670_v31  ;;  %v662_v31 = vld [vmem:[%s5331_s1 + $0x13e8] sm:$0xff]  ;;  %v2704_v11 = vpack.c.bf16 %v658_v30, %v655_v29  ;;  %v667_v27 = vld [vmem:[%s5331_s1 + $0x1410] sm:$0xff] }
 0x149   :  { %v2706_v42 = vpack.c.bf16 %v665_v32, %v662_v31  ;;  %v1788_v29 = vld [vmem:[%s5333_s3 + $0xe8] sm:$0xff]  ;;  %v1771_v32 = vld [vmem:[%s5333_s3 + $0x60] sm:$0xff] }
 0x14b   :  { %2673 = vmatpush1.bf16.msra.mxu0 %v2672_v36  ;;  %v664_v36 = vld [vmem:[%s5331_s1 + $0x13f8] sm:$0xff] }
 0x14c   :  { %2675 = vmatprep.subr.bf16.mxu0 %v2674_v37  ;;  %v668_v37 = vld [vmem:[%s5331_s1 + $0x1418] sm:$0xff]  ;;  %v2708_v40 = vpack.c.bf16 %v664_v36, %v661_v35 }
 0x14d   :  { %v2710_v43 = vpack.c.bf16 %v671_v39, %v668_v37 }
 0x14f   :  { %2677 = vmatpush1.bf16.msra.mxu0 %v2676_v20  ;;  %v670_v20 = vld [vmem:[%s5331_s1 + $0x1428] sm:$0xff] }
 0x150   :  { %2679 = vmatprep.subr.bf16.mxu0 %v2678_v44  ;;  %v2712_v44 = vpack.c.bf16 %v670_v20, %v667_v27  ;;  %v1773_v20 = vld [vmem:[%s5333_s3 + $0x70] sm:$0xff] }
 0x153   :  { %2681 = vmatpush1.bf16.msra.mxu0 %v2680_v47  ;;  %v1775_v47 = vld [vmem:[%s5333_s3 + $0x80] sm:$0xff] }
 0x154   :  { %2683 = vmatprep.subr.bf16.mxu0 %v2682_v49  ;;  %v1776_v49 = vld [vmem:[%s5333_s3 + $0x88] sm:$0xff] }
 0x155   :  { %v2942_v53 = vpack.c.bf16 %v1776_v49, %v1775_v47 }
 0x157   :  { %2685 = vmatpush1.bf16.msra.mxu0 %v2684_v57  ;;  %v2946_v57 = vpack.c.bf16 %v1778_v55, %v1777_v54  ;;  %2943 = vmatprep.subr.bf16.mxu1 %v2942_v53  ;;  %v681_v54 = vsub.s32 1, %v3335_v61 }
 0x158   :  { %2687 = vmatprep.subr.bf16.mxu0 %v2686_v59  ;;  %v2052_v9 = vpop.f32.mrb[4].mxu1  ;;  %v1761_v59 = vld [vmem:[%s5333_s3 + $0x10] sm:$0xff] }
 0x159   :  { %v2053_v15 = vpop.f32.mrb[5].mxu1  ;;  %v2948_v0 = vpack.c.bf16 %v1762_v33, %v1761_v59 }
 0x15a   :  { %v2054_v16 = vadd.f32 %v2053_v15, %v2052_v9  ;;  %v2954_v9 = vpack.c.bf16 %v1782_v6, %v1781_v5  ;;  %v1783_v15 = vld [vmem:[%s5333_s3 + $0xc0] sm:$0xff]  ;;  %v3051_v6 = vmov 0.0  }
 0x15b   :  { %2689 = vmatpush1.bf16.msra.mxu0 %v2688_v3  ;;  %v1763_v3 = vld [vmem:[%s5333_s3 + $0x20] sm:$0xff] }
 0x15c   :  { %2691 = vmatprep.subr.bf16.mxu0 %v2690_v34  ;;  %v1403_v52 = vadd.f32 %v2054_v16, %v1333_v8  ;;  %v1764_v34 = vld [vmem:[%s5333_s3 + $0x28] sm:$0xff] }
 0x15d   :  { %v2952_v8 = vpack.c.bf16 %v1764_v34, %v1763_v3  ;;  %v1784_v16 = vld [vmem:[%s5333_s3 + $0xc8] sm:$0xff] }
 0x15e   :  { %v2958_v18 = vpack.c.bf16 %v1784_v16, %v1783_v15  ;;  %v1798_v15 = vld [vmem:[%s5333_s3 + $0x138] sm:$0xff] }
 0x15f   :  { %2693 = vmatpush1.bf16.msra.mxu0 %v2692_v48  ;;  %v2956_v48 = vpack.c.bf16 %v1766_v13, %v1765_v10  ;;  %v1797_v13 = vld [vmem:[%s5333_s3 + $0x130] sm:$0xff] }
 0x160   :  { %2695 = vmatprep.subr.bf16.mxu0 %v2694_v17  ;;  %v2984_v16 = vpack.c.bf16 %v1798_v15, %v1797_v13 }
 0x163   :  { %2697 = vmatpush1.bf16.msra.mxu0 %v2696_v22  ;;  %v1786_v22 = vld [vmem:[%s5333_s3 + $0xd8] sm:$0xff] }
 0x164   :  { %2699 = vmatprep.subr.bf16.mxu0 %v2698_v23  ;;  %v2962_v63 = vpack.c.bf16 %v1786_v22, %v1785_v51  ;;  %v1803_v51 = vld [vmem:[%s5333_s3 + $0x160] sm:$0xff]  ;;  %v1804_v22 = vld [vmem:[%s5333_s3 + $0x168] sm:$0xff] }
 0x167   :  { %2701 = vmatpush1.bf16.msra.mxu0 %v2700_v41  ;;  %v1770_v41 = vld [vmem:[%s5333_s3 + $0x58] sm:$0xff] }
 0x168   :  { %2703 = vmatprep.subr.bf16.mxu0 %v2702_v28  ;;  %v1787_v28 = vld [vmem:[%s5333_s3 + $0xe0] sm:$0xff]  ;;  %v2964_v30 = vpack.c.bf16 %v1770_v41, %v1769_v26 }
 0x169   :  { %v2966_v31 = vpack.c.bf16 %v1788_v29, %v1787_v28 }
 0x16b   :  { %2705 = vmatpush1.bf16.msra.mxu0 %v2704_v11  ;;  %v1772_v11 = vld [vmem:[%s5333_s3 + $0x68] sm:$0xff] }
 0x16c   :  { %2707 = vmatprep.subr.bf16.mxu0 %v2706_v42  ;;  %v2968_v42 = vpack.c.bf16 %v1772_v11, %v1771_v32 }
 0x16f   :  { %2709 = vmatpush1.bf16.msra.mxu0 %v2708_v40  ;;  %v1789_v40 = vld [vmem:[%s5333_s3 + $0xf0] sm:$0xff] }
 0x170   :  { %2711 = vmatprep.subr.bf16.mxu0 %v2710_v43  ;;  %v1790_v43 = vld [vmem:[%s5333_s3 + $0xf8] sm:$0xff] }
 0x171   :  { %v2970_v27 = vpack.c.bf16 %v1790_v43, %v1789_v40 }
 0x173   :  { %2713 = vmatpush1.bf16.msra.mxu0 %v2712_v44  ;;  %v1774_v44 = vld [vmem:[%s5333_s3 + $0x78] sm:$0xff] }
 0x176   :  { %1260 = vmatmul.mubr.f32.vlgmr.msra.gmra.mrb[0].mxu0 %v4728_v12  ;;  %v1760_v12 = vld [vmem:[%s5333_s3 + $0x8] sm:$0xff] }
 0x177   :  { %v2944_v56 = vpack.c.bf16 %v1760_v12, %v1759_v50  ;;  %v677_v12 = vsub.s32 0, %v3335_v61 }
 0x178   :  { %v2087_v45 = vpop.f32.mrb[6].mxu1 }
 0x179   :  { %v2088_v38 = vpop.f32.mrb[7].mxu1  ;;  %2945 = vmatpush3.bf16.msra.mxu1 %v2944_v56  ;;  %v678_v55 = vrot.slane %v5071_v58, %v677_v12  ;;  %v682_v56 = vrot.slane %v5071_v58, %v681_v54 }
 0x17a   :  { %v2089_v46 = vadd.f32 %v2088_v38, %v2087_v45  ;;  %2947 = vmatprep.subr.bf16.mxu1 %v2946_v57  ;;  %v2972_v45 = vpack.c.bf16 %v1774_v44, %v1773_v20 }
 0x17b   :  { %v836_v57 = vadd.f32 %v4847_v4, %v678_v55  ;;  %v838_v59 = vadd.f32 %v4855_v7, %v682_v56  ;;  %v1793_v4 = vld [vmem:[%s5333_s3 + $0x110] sm:$0xff]  ;;  %v1794_v7 = vld [vmem:[%s5333_s3 + $0x118] sm:$0xff] }
 0x17c   :  { %v1473_v1 = vadd.f32 %v2089_v46, %v1403_v52  ;;  %v1768_v52 = vld [vmem:[%s5333_s3 + $0x48] sm:$0xff]  ;;  %v2978_v58 = vpack.c.bf16 %v1794_v7, %v1793_v4 }
 0x17d   :  { %2949 = vmatpush3.bf16.msra.mxu1 %v2948_v0  ;;  %v2960_v25 = vpack.c.bf16 %v1768_v52, %v1767_v19  ;;  %v1791_v0 = vld [vmem:[%s5333_s3 + $0x100] sm:$0xff]  ;;  %v1801_v19 = vld [vmem:[%s5333_s3 + $0x150] sm:$0xff]  ;;  %v1802_v52 = vld [vmem:[%s5333_s3 + $0x158] sm:$0xff] }
 0x17e   :  { %2951 = vmatprep.subr.bf16.mxu1 %v2950_v2  ;;  %v1792_v2 = vld [vmem:[%s5333_s3 + $0x108] sm:$0xff] }
 0x17f   :  { %v2975_v34 = vpack.c.bf16 %v1792_v2, %v1791_v0 }
 0x181   :  { %2953 = vmatpush3.bf16.msra.mxu1 %v2952_v8  ;;  %v1795_v8 = vld [vmem:[%s5333_s3 + $0x120] sm:$0xff] }
 0x182   :  { %2955 = vmatprep.subr.bf16.mxu1 %v2954_v9  ;;  %v1796_v9 = vld [vmem:[%s5333_s3 + $0x128] sm:$0xff] }
 0x183   :  { %v2981_v10 = vpack.c.bf16 %v1796_v9, %v1795_v8 }
 0x185   :  { %2957 = vmatpush3.bf16.msra.mxu1 %v2956_v48  ;;  %v1799_v48 = vld [vmem:[%s5333_s3 + $0x140] sm:$0xff] }
 0x186   :  { %2959 = vmatprep.subr.bf16.mxu1 %v2958_v18 }
 0x189   :  { %2961 = vmatpush3.bf16.msra.mxu1 %v2960_v25  ;;  %v1805_v25 = vld [vmem:[%s5333_s3 + $0x170] sm:$0xff] }
 0x18a   :  { %2963 = vmatprep.subr.bf16.mxu1 %v2962_v63 }
 0x18d   :  { %2965 = vmatpush3.bf16.msra.mxu1 %v2964_v30  ;;  %v1984_v30 = vld [vmem:[%s5334_s4] ss:$0 sm:$0xff] }
 0x18e   :  { %2967 = vmatprep.subr.bf16.mxu1 %v2966_v31 }
 0x191   :  { %2969 = vmatpush3.bf16.msra.mxu1 %v2968_v42 }
 0x192   :  { %2971 = vmatprep.subr.bf16.mxu1 %v2970_v27 }
 0x195   :  { %2973 = vmatpush3.bf16.msra.mxu1 %v2972_v45 }
 0x196   :  { %2974 = vmatprep.subr.bf16.mxu1 %v3049_v14 }
 0x198   :  { %v2122_v17 = vpop.f32.mrb[8].mxu1 }
 0x199   :  { %v2123_v21 = vpop.f32.mrb[9].mxu1 }
 0x19a   :  { %v2124_v23 = vadd.f32 %v2123_v21, %v2122_v17  ;;  %v1800_v17 = vld [vmem:[%s5333_s3 + $0x148] sm:$0xff]  ;;  %v2990_v21 = vpack.c.bf16 %v1802_v52, %v1801_v19 }
 0x19b   :  { %v2987_v18 = vpack.c.bf16 %v1800_v17, %v1799_v48 }
 0x19c   :  { %v1543_v24 = vadd.f32 %v2124_v23, %v1473_v1  ;;  %v2993_v23 = vpack.c.bf16 %v1804_v22, %v1803_v51 }
 0x1b8   :  { %v2157_v35 = vpop.f32.mrb[10].mxu1 }
 0x1b9   :  { %v2158_v36 = vpop.f32.mrb[11].mxu1 }
 0x1ba   :  { %v2159_v37 = vadd.f32 %v2158_v36, %v2157_v35 }
 0x1bc   :  { %v1613_v39 = vadd.f32 %v2159_v37, %v1543_v24  ;;  %v1806_v24 = vld [vmem:[%s5333_s3 + $0x178] sm:$0xff]  ;;  %s3052_s3 = smov [#allocation2]  }
 0x1bd   :  { %v2996_v63 = vpack.c.bf16 %v1806_v24, %v1805_v25  ;;  %s1973_s4 = sshll.u32 %s3052_s3, 4  ;;  %s1974_s4 = int_to_ptr.vmem [resolvable:$true] %s1973_s4 }
 0x1be   :  { %s3024_s23 = scalar_lea.vmem %s1974_s4, 32  ;;  %p3029_p1 = scmp.lt.s32.totalorder %s1974_s4, %s1974_s4 }
 0x1bf   :  { %p3025_p0 = scmp.ne.s32.totalorder %s1974_s4, %s3024_s23  ;;  %p3030_p2 = scmp.lt.s32.totalorder %s3024_s23, %s3024_s23 }
 0x1c1   :  { %p3031_p3 = por %p3030_p2, %p3029_p1 }
 0x1c3   :  { %p3032_p4 = pnand %p3031_p3, %p3025_p0 }
 0x1d8   :  { %v2192_v38 = vpop.f32.mrb[12].mxu1 }
 0x1d9   :  { %v2193_v46 = vpop.f32.mrb[13].mxu1 }
 0x1da   :  { %v2194_v1 = vadd.f32 %v2193_v46, %v2192_v38 }
 0x1dc   :  { %v1683_v47 = vadd.f32 %v2194_v1, %v1613_v39 }
 0x208   :  { %v1752_v49 = vpop.f32.mrb[14].mxu1 }
 0x209   :  { %v1753_v50 = vadd.f32 %v1752_v49, %v1683_v47  ;;  %v1754_v53 = vpop.f32.mrb[15].mxu1 }
 0x20b   :  { %v1758_v26 = vmax.f32 %v1753_v50, 0.0 }
 0x249   :  { %v1261_v33 = vpop.f32.mrb[0].mxu0 }
 0x24a   :  { %v2999_v60 = vadd.f32 %v1261_v33, %v836_v57  ;;  %v1263_v62 = vpop.f32.mrb[1].mxu0 }
 0x24b   :  { %v3001_v61 = vadd.f32 %v1263_v62, %v838_v59 }
 0x24c   :  { %v1756_v5 = vmax.f32 %v2999_v60, 0.0 }
 0x24d   :  { %v1757_v3 = vmax.f32 %v3001_v61, 0.0 }
 0x24f   :  { %1878 = vmatprep.mubr.f32.mxu1 %v1757_v3 }
 0x250   :  { %1879 = vmatmul.mubr.f32.vlgmr.msra.gmra.mrb[16].mxu1 %v1756_v5 }
 0x251   :  { %2976 = vmatpush3.bf16.msra.mxu1 %v2975_v34  ;;  %2279 = vmatprep.mubr.msk.f32.mxu1 %vm3050_vm1, %v3051_v6 }
 0x252   :  { %2977 = vmatprep.subr.bf16.mxu1 %v3049_v14 }
 0x255   :  { %2979 = vmatpush3.bf16.msra.mxu1 %v2978_v58 }
 0x256   :  { %2980 = vmatprep.subr.bf16.mxu1 %v3049_v14 }
 0x259   :  { %2982 = vmatpush3.bf16.msra.mxu1 %v2981_v10 }
 0x25a   :  { %2983 = vmatprep.subr.bf16.mxu1 %v3049_v14 }
 0x25d   :  { %2985 = vmatpush3.bf16.msra.mxu1 %v2984_v16 }
 0x25e   :  { %2986 = vmatprep.subr.bf16.mxu1 %v3049_v14 }
 0x261   :  { %2988 = vmatpush3.bf16.msra.mxu1 %v2987_v18 }
 0x262   :  { %2989 = vmatprep.subr.bf16.mxu1 %v3049_v14 }
 0x265   :  { %2991 = vmatpush3.bf16.msra.mxu1 %v2990_v21 }
 0x266   :  { %2992 = vmatprep.subr.bf16.mxu1 %v3049_v14 }
 0x269   :  { %2994 = vmatpush3.bf16.msra.mxu1 %v2993_v23 }
 0x26a   :  { %2995 = vmatprep.subr.bf16.mxu1 %v3049_v14 }
 0x26d   :  { %2997 = vmatpush3.bf16.msra.mxu1 %v2996_v63 }
 0x270   :  { %2280 = vmatmul.mubr.f32.vlgmr.msra.gmra.mrb[18].mxu1 %v1758_v26 }
 0x323   :  { %v2227_v41 = vpop.f32.mrb[16].mxu1 }
 0x324   :  { %v2228_v28 = vpop.f32.mrb[17].mxu1 }
 0x325   :  { %v2229_v29 = vadd.f32 %v2228_v28, %v2227_v41 }
 0x327   :  { %v1881_v31 = vadd.f32 %v2229_v29, %v1984_v30 }
 0x343   :  { %v1950_v32 = vpop.f32.mrb[18].mxu1 }
 0x344   :  { %v1951_v11 = vadd.f32 %v1950_v32, %v1881_v31  ;;  %v2281_v42 = vpop.f32.mrb[19].mxu1 }
 0x346   :  { %v1955_v35 = vsel %vm1954_vm2, %v1951_v11, -inf }
 0x347   :  { %1956 = vmax.xlane.f32.xlu0 %v1955_v35 }
 0x3d4   :  { %v1957_v36 = vpop.xlane.xlu0 %1956 }
 0x3d5   :  { %v1958_v14 = vsub.f32 %v1951_v11, %v1957_v36 }
 0x3d7   :  { %v1959_v37 = vmul.f32 1.442695, %v1958_v14 }
 0x3d9   :  { %3020 = vpow2.f32 %v1959_v37 }
 0x3e3   :  { %v3021_v39 = vpop.eup %3020 }
 0x3e4   :  { %v1961_v40 = vsel %vm1954_vm2, %v3021_v39, 0.0 }
 0x3e5   :  { %1962 = vadd.xlane.f32.xlu0 %v1961_v40 }
 0x472   :  { %v1963_v43 = vpop.xlane.xlu0 %1962 }
 0x473   :  { %3022 = vrcp.f32 %v1963_v43 }
 0x47d   :  { %v3023_v27 = vpop.eup %3022 }
 0x47e   :  { %v1965_v20 = vmul.f32 %v3023_v27, %v3021_v39 }
 0x480   :  { %1966 = vst.msk [vmem:[#allocation2] sm:$0x3] %vm1954_vm2, %v1965_v20 }
 0x481   :  { %3035 = shalt.err (!%p3032_p4)
}
 0x482   :  { %s3036_s26 = scalar_lea.hbm %s5335_s5, 32 }
 0x483   :  { %p3037_p5 = scmp.ne.s32.totalorder %s5335_s5, %s3036_s26  ;;  %p3040_p6 = scmp.lt.u32.totalorder %s3036_s26, %s5335_s5 }
 0x485   :  { %p3042_p7 = pnand %p3040_p6, %p3037_p5 }
 0x487   :  { %3045 = shalt.err (!%p3042_p7)
}
 0x488   :  { %1976 = dma.vmem_to_hbm [thread:$0]  %s1974_s4, 32, %s5335_s5, [#allocation3]  }
 0x489   :  { %3046 = dma.done.wait [#allocation3], 32  }
 0x48a   :  { %3047 = vsyncadd [#allocation3], 4294967264 }
 0x48b   :  { %1980 = vsyncpa [#allocation3], 1 }

</bundles_post_ra>
